<compile_context>
chip_gen: v6e
topology: v6e:2x2x1
jax: 0.10.0
libtpu: 0.0.40
codegen_flags: <defaults>
</compile_context>

<pallas_src>
import functools
import math

import jax
import jax.numpy as jnp
from jax import lax
from jax.experimental import pallas as pl
from jax.experimental.pallas import tpu as pltpu


CFG = dict(
    vocab_size=100,
    type_vocab_size=2,
    max_position=16,
    hidden=32,
    num_layers=2,
    num_heads=2,
    intermediate=64,
    seq_len=8,
    batch=2,
    num_classes=3,
)

_NC_PAD = 128  # lane-dense padded width for the classifier-head output


# ----------------------------------------------------------------------------
# In-kernel helpers (traced inside the Pallas kernel body)
# ----------------------------------------------------------------------------

def _layer_norm(x, g, b, eps):
    mu = jnp.mean(x, axis=-1, keepdims=True)
    var = jnp.mean((x - mu) * (x - mu), axis=-1, keepdims=True)
    return (x - mu) * lax.rsqrt(var + eps) * g + b


def _gelu(x):
    # exact (erf-based) GELU, matching HF BERT / torch default nn.GELU
    return 0.5 * x * (1.0 + lax.erf(x / jnp.sqrt(jnp.float32(2.0))))


def _mm(x, w_bf16, b):
    """bf16 MXU matmul with f32 accumulation + bias: (M,K)@(K,N) + (1,N)."""
    return jnp.dot(x.astype(jnp.bfloat16), w_bf16,
                   preferred_element_type=jnp.float32) + b


# ----------------------------------------------------------------------------
# Fused whole-model Pallas kernel
# ----------------------------------------------------------------------------

def _bert_fused_kernel(
        emb_ref, mask_ref, emb_ln_g_ref, emb_ln_b_ref,
        wqkv_ref, bqkv_ref, wao_ref, bao_ref, ln1_g_ref, ln1_b_ref,
        wff1_ref, bff1_ref, wff2_ref, bff2_ref, ln2_g_ref, ln2_b_ref,
        pool_w_ref, pool_b_ref, fc_w_ref, fc_b_ref,
        out_ref,
        *, num_layers, batch, seq, num_heads, head_dim, eps):
    H = num_heads * head_dim
    scale = 1.0 / math.sqrt(head_dim)

    # --- embeddings LayerNorm (dropout p=0.1 is identity in eval mode) ---
    h = _layer_norm(emb_ref[...], emb_ln_g_ref[...], emb_ln_b_ref[...], eps)
    mask = mask_ref[...]                          # (B, S) additive bias

    for l in range(num_layers):
        # --- fused QKV projection: (B*S, 3H) ---
        qkv = _mm(h, wqkv_ref[l], bqkv_ref[l])

        # --- multi-head self-attention (static loops over batch & head) ---
        ctx_rows = []
        for b in range(batch):
            r0 = b * seq
            mbias = mask[b:b + 1, :]              # (1, S) -> broadcast over queries
            head_outs = []
            for hh in range(num_heads):
                c0 = hh * head_dim
                qh = qkv[r0:r0 + seq, c0:c0 + head_dim]
                kh = qkv[r0:r0 + seq, H + c0:H + c0 + head_dim]
                vh = qkv[r0:r0 + seq, 2 * H + c0:2 * H + c0 + head_dim]
                s = jnp.einsum("qd,kd->qk",
                               qh.astype(jnp.bfloat16),
                               kh.astype(jnp.bfloat16),
                               preferred_element_type=jnp.float32) * scale
                s = s + mbias
                s = s - jnp.max(s, axis=-1, keepdims=True)
                p = jnp.exp(s)
                p = p * pl.reciprocal(jnp.sum(p, axis=-1, keepdims=True),
                                      approx=True)
                head_outs.append(
                    jnp.einsum("qk,kd->qd",
                               p.astype(jnp.bfloat16),
                               vh.astype(jnp.bfloat16),
                               preferred_element_type=jnp.float32))
            ctx_rows.append(jnp.concatenate(head_outs, axis=-1))   # (S, H)
        ctx = jnp.concatenate(ctx_rows, axis=0)                    # (B*S, H)

        # --- attention output projection + residual + LN (fused epilogue) ---
        attn_out = _mm(ctx, wao_ref[l], bao_ref[l])
        h = _layer_norm(h + attn_out, ln1_g_ref[l], ln1_b_ref[l], eps)

        # --- feed forward (GELU) + residual + LN (fused epilogue) ---
        ff = _gelu(_mm(h, wff1_ref[l], bff1_ref[l]))
        ff = _mm(ff, wff2_ref[l], bff2_ref[l])
        h = _layer_norm(h + ff, ln2_g_ref[l], ln2_b_ref[l], eps)

    # --- pooler: tanh(Linear(hidden[:, 0, :])) on CLS rows ---
    cls = jnp.concatenate([h[b * seq:b * seq + 1, :] for b in range(batch)],
                          axis=0)                                   # (B, H)
    pooled = jnp.tanh(_mm(cls, pool_w_ref[...], pool_b_ref[...]))

    # --- dropout(0.1) eval => identity; classifier head (lane-padded to 128) ---
    # TODO(synk): training-mode dropout (p=0.1) not implemented; inference semantics used.
    logits = _mm(pooled, fc_w_ref[...], fc_b_ref[...])              # (B, NC_PAD)
    out_ref[...] = logits.astype(out_ref.dtype)


# ----------------------------------------------------------------------------
# Synthetic (deterministic) BERT parameters + kernel-ready packing
# ----------------------------------------------------------------------------

def init_params(key, cfg):
    H, I = cfg["hidden"], cfg["intermediate"]
    std = 0.02

    def nrm(k, shape):
        return (std * jax.random.normal(k, shape)).astype(jnp.float32)

    keys = iter(jax.random.split(key, 16 + 12 * cfg["num_layers"]))
    p = {
        "word_emb": nrm(next(keys), (cfg["vocab_size"], H)),
        "pos_emb": nrm(next(keys), (cfg["max_position"], H)),
        "type_emb": nrm(next(keys), (cfg["type_vocab_size"], H)),
        "emb_ln_g": jnp.ones((H,), jnp.float32),
        "emb_ln_b": jnp.zeros((H,), jnp.float32),
        "pool_w": nrm(next(keys), (H, H)),
        "pool_b": jnp.zeros((H,), jnp.float32),
        "fc_w": nrm(next(keys), (H, cfg["num_classes"])),
        "fc_b": jnp.zeros((cfg["num_classes"],), jnp.float32),
        "layers": [],
    }
    for _ in range(cfg["num_layers"]):
        p["layers"].append({
            "q_w": nrm(next(keys), (H, H)), "q_b": jnp.zeros((H,), jnp.float32),
            "k_w": nrm(next(keys), (H, H)), "k_b": jnp.zeros((H,), jnp.float32),
            "v_w": nrm(next(keys), (H, H)), "v_b": jnp.zeros((H,), jnp.float32),
            "ao_w": nrm(next(keys), (H, H)), "ao_b": jnp.zeros((H,), jnp.float32),
            "ln1_g": jnp.ones((H,), jnp.float32), "ln1_b": jnp.zeros((H,), jnp.float32),
            "ff1_w": nrm(next(keys), (H, I)), "ff1_b": jnp.zeros((I,), jnp.float32),
            "ff2_w": nrm(next(keys), (I, H)), "ff2_b": jnp.zeros((H,), jnp.float32),
            "ln2_g": jnp.ones((H,), jnp.float32), "ln2_b": jnp.zeros((H,), jnp.float32),
        })
    return p


def pack_params(params, cfg):
    """Stack layer weights, fuse QKV, cast matmul weights to bf16, pad fc head."""
    L, H, I = cfg["num_layers"], cfg["hidden"], cfg["intermediate"]
    NC = cfg["num_classes"]
    layers = params["layers"]

    def stack(name):
        return jnp.stack([lp[name] for lp in layers], axis=0)

    wqkv = jnp.stack(
        [jnp.concatenate([lp["q_w"], lp["k_w"], lp["v_w"]], axis=1)
         for lp in layers], axis=0)                                 # (L, H, 3H)
    bqkv = jnp.stack(
        [jnp.concatenate([lp["q_b"], lp["k_b"], lp["v_b"]],
                         axis=0).reshape(1, 3 * H)
         for lp in layers], axis=0)                                 # (L, 1, 3H)

    fc_w_pad = jnp.zeros((H, _NC_PAD), jnp.float32).at[:, :NC].set(params["fc_w"])
    fc_b_pad = jnp.zeros((1, _NC_PAD), jnp.float32).at[0, :NC].set(params["fc_b"])

    bf16 = lambda a: a.astype(jnp.bfloat16)
    return {
        "word_emb": params["word_emb"],
        "pos_emb": params["pos_emb"],
        "type_emb": params["type_emb"],
        "emb_ln_g": params["emb_ln_g"].reshape(1, H),
        "emb_ln_b": params["emb_ln_b"].reshape(1, H),
        "wqkv": bf16(wqkv),
        "bqkv": bqkv,
        "wao": bf16(stack("ao_w")),
        "bao": stack("ao_b").reshape(L, 1, H),
        "ln1_g": stack("ln1_g").reshape(L, 1, H),
        "ln1_b": stack("ln1_b").reshape(L, 1, H),
        "wff1": bf16(stack("ff1_w")),
        "bff1": stack("ff1_b").reshape(L, 1, I),
        "wff2": bf16(stack("ff2_w")),
        "bff2": stack("ff2_b").reshape(L, 1, H),
        "ln2_g": stack("ln2_g").reshape(L, 1, H),
        "ln2_b": stack("ln2_b").reshape(L, 1, H),
        "pool_w": bf16(params["pool_w"]),
        "pool_b": params["pool_b"].reshape(1, H),
        "fc_w": bf16(fc_w_pad),
        "fc_b": fc_b_pad,
    }


# ----------------------------------------------------------------------------
# Forward pass (matches BERTSentimentClassifier.forward semantics)
# ----------------------------------------------------------------------------

def bert_sentiment_forward(packed, input_ids, attention_mask, cfg):
    B, S = input_ids.shape
    H = cfg["hidden"]
    nH = cfg["num_heads"]
    dH = H // nH

    # --- embeddings: gathers are plain-JAX glue feeding the fused kernel ---
    positions = jnp.arange(S, dtype=jnp.int32)
    emb = (jnp.take(packed["word_emb"], input_ids, axis=0)
           + jnp.take(packed["pos_emb"], positions, axis=0)[None, :, :]
           + packed["type_emb"][0][None, None, :])          # token_type_ids = 0
    emb = emb.reshape(B * S, H).astype(jnp.float32)

    # HF-style extended additive attention mask, kept as (B, S)
    mask_bias = (1.0 - attention_mask.astype(jnp.float32)) * -10000.0

    kernel = functools.partial(
        _bert_fused_kernel,
        num_layers=cfg["num_layers"], batch=B, seq=S,
        num_heads=nH, head_dim=dH, eps=1e-12)

    logits_padded = pl.pallas_call(
        kernel,
        out_shape=jax.ShapeDtypeStruct((B, _NC_PAD), jnp.float32),
        compiler_params=pltpu.CompilerParams(vmem_limit_bytes=16 * 1024 * 1024),
    )(emb, mask_bias,
      packed["emb_ln_g"], packed["emb_ln_b"],
      packed["wqkv"], packed["bqkv"],
      packed["wao"], packed["bao"],
      packed["ln1_g"], packed["ln1_b"],
      packed["wff1"], packed["bff1"],
      packed["wff2"], packed["bff2"],
      packed["ln2_g"], packed["ln2_b"],
      packed["pool_w"], packed["pool_b"],
      packed["fc_w"], packed["fc_b"])

    return logits_padded[:, :cfg["num_classes"]]    # (B, num_classes)


# ----------------------------------------------------------------------------
# Main
# ----------------------------------------------------------------------------

if __name__ == "__main__":
    key = jax.random.PRNGKey(0)
    k_param, k_ids = jax.random.split(key)

    params = init_params(k_param, CFG)
    packed = pack_params(params, CFG)

    B, S = CFG["batch"], CFG["seq_len"]
    input_ids = jax.random.randint(k_ids, (B, S), 0, CFG["vocab_size"],
                                   dtype=jnp.int32)
    # second sequence has 3 padding positions masked out
    attention_mask = jnp.array(
        [[1] * S,
         [1] * (S - 3) + [0] * 3], dtype=jnp.int32)

    forward = jax.jit(functools.partial(bert_sentiment_forward, cfg=CFG))
    logits = forward(packed, input_ids, attention_mask)
    logits = jax.block_until_ready(logits)

    assert logits.shape == (B, CFG["num_classes"])
    assert bool(jnp.all(jnp.isfinite(logits)))
    print("KERNEL_OK")
</pallas_src>

<mosaic_0001>
module attributes {stable_mosaic.version = 11 : i64} {
  func.func @_bert_fused_kernel(%arg0: memref<16x32xf32, #tpu.memory_space<vmem>>, %arg1: memref<2x8xf32, #tpu.memory_space<vmem>>, %arg2: memref<1x32xf32, #tpu.memory_space<vmem>>, %arg3: memref<1x32xf32, #tpu.memory_space<vmem>>, %arg4: memref<2x32x96xbf16, #tpu.memory_space<vmem>>, %arg5: memref<2x1x96xf32, #tpu.memory_space<vmem>>, %arg6: memref<2x32x32xbf16, #tpu.memory_space<vmem>>, %arg7: memref<2x1x32xf32, #tpu.memory_space<vmem>>, %arg8: memref<2x1x32xf32, #tpu.memory_space<vmem>>, %arg9: memref<2x1x32xf32, #tpu.memory_space<vmem>>, %arg10: memref<2x32x64xbf16, #tpu.memory_space<vmem>>, %arg11: memref<2x1x64xf32, #tpu.memory_space<vmem>>, %arg12: memref<2x64x32xbf16, #tpu.memory_space<vmem>>, %arg13: memref<2x1x32xf32, #tpu.memory_space<vmem>>, %arg14: memref<2x1x32xf32, #tpu.memory_space<vmem>>, %arg15: memref<2x1x32xf32, #tpu.memory_space<vmem>>, %arg16: memref<32x32xbf16, #tpu.memory_space<vmem>>, %arg17: memref<1x32xf32, #tpu.memory_space<vmem>>, %arg18: memref<32x128xbf16, #tpu.memory_space<vmem>>, %arg19: memref<1x128xf32, #tpu.memory_space<vmem>>, %arg20: memref<2x128xf32, #tpu.memory_space<vmem>>) attributes {dimension_semantics = [], scalar_prefetch = 0 : i64, scratch_operands = 0 : i64, tpu.core_type = #tpu.core_type<tc>} {
    %c0 = arith.constant 0 : index
    %c0_0 = arith.constant 0 : index
    %0 = vector.load %arg0[%c0, %c0_0] : memref<16x32xf32, #tpu.memory_space<vmem>>, vector<16x32xf32>
    %c0_1 = arith.constant 0 : index
    %c0_2 = arith.constant 0 : index
    %1 = vector.load %arg2[%c0_1, %c0_2] : memref<1x32xf32, #tpu.memory_space<vmem>>, vector<1x32xf32>
    %c0_3 = arith.constant 0 : index
    %c0_4 = arith.constant 0 : index
    %2 = vector.load %arg3[%c0_3, %c0_4] : memref<1x32xf32, #tpu.memory_space<vmem>>, vector<1x32xf32>
    %cst = arith.constant dense<0.000000e+00> : vector<16xf32>
    %3 = vector.multi_reduction <add>, %0, %cst [1] : vector<16x32xf32> to vector<16xf32>
    %4 = vector.shape_cast %3 : vector<16xf32> to vector<16x1xf32>
    %cst_5 = arith.constant 3.200000e+01 : f32
    %5 = vector.broadcast %cst_5 : f32 to vector<16x1xf32>
    %6 = arith.divf %4, %5 : vector<16x1xf32>
    %7 = vector.broadcast %6 : vector<16x1xf32> to vector<16x32xf32>
    %8 = arith.subf %0, %7 : vector<16x32xf32>
    %9 = vector.broadcast %6 : vector<16x1xf32> to vector<16x32xf32>
    %10 = arith.subf %0, %9 : vector<16x32xf32>
    %11 = arith.mulf %8, %10 : vector<16x32xf32>
    %cst_6 = arith.constant dense<0.000000e+00> : vector<16xf32>
    %12 = vector.multi_reduction <add>, %11, %cst_6 [1] : vector<16x32xf32> to vector<16xf32>
    %13 = vector.shape_cast %12 : vector<16xf32> to vector<16x1xf32>
    %cst_7 = arith.constant 3.200000e+01 : f32
    %14 = vector.broadcast %cst_7 : f32 to vector<16x1xf32>
    %15 = arith.divf %13, %14 : vector<16x1xf32>
    %16 = vector.broadcast %6 : vector<16x1xf32> to vector<16x32xf32>
    %17 = arith.subf %0, %16 : vector<16x32xf32>
    %cst_8 = arith.constant 9.99999996E-13 : f32
    %18 = vector.broadcast %cst_8 : f32 to vector<16x1xf32>
    %19 = arith.addf %15, %18 : vector<16x1xf32>
    %20 = math.rsqrt %19 : vector<16x1xf32>
    %21 = vector.broadcast %20 : vector<16x1xf32> to vector<16x32xf32>
    %22 = arith.mulf %17, %21 : vector<16x32xf32>
    %23 = vector.broadcast %1 : vector<1x32xf32> to vector<16x32xf32>
    %24 = arith.mulf %22, %23 : vector<16x32xf32>
    %25 = vector.broadcast %2 : vector<1x32xf32> to vector<16x32xf32>
    %26 = arith.addf %24, %25 : vector<16x32xf32>
    %c0_9 = arith.constant 0 : index
    %c0_10 = arith.constant 0 : index
    %27 = vector.load %arg1[%c0_9, %c0_10] : memref<2x8xf32, #tpu.memory_space<vmem>>, vector<2x8xf32>
    %c0_11 = arith.constant 0 : index
    %c0_12 = arith.constant 0 : index
    %c0_13 = arith.constant 0 : index
    %28 = vector.load %arg4[%c0_11, %c0_12, %c0_13] : memref<2x32x96xbf16, #tpu.memory_space<vmem>>, vector<1x32x96xbf16>
    %29 = vector.shape_cast %28 : vector<1x32x96xbf16> to vector<32x96xbf16>
    %c0_14 = arith.constant 0 : index
    %c0_15 = arith.constant 0 : index
    %c0_16 = arith.constant 0 : index
    %30 = vector.load %arg5[%c0_14, %c0_15, %c0_16] : memref<2x1x96xf32, #tpu.memory_space<vmem>>, vector<1x1x96xf32>
    %31 = vector.shape_cast %30 : vector<1x1x96xf32> to vector<1x96xf32>
    %32 = arith.truncf %26 : vector<16x32xf32> to vector<16x32xbf16>
    %cst_17 = arith.constant dense<0.000000e+00> : vector<16x96xf32>
    %33 = tpu.matmul %32, %29, %cst_17 {dimension_numbers = #tpu.dot_dimension_numbers<[1], [0], [0], [1], [0, 0, 1, 1], [], []>} : vector<16x32xbf16>, vector<32x96xbf16>, vector<16x96xf32> -> vector<16x96xf32>
    %34 = vector.broadcast %31 : vector<1x96xf32> to vector<16x96xf32>
    %35 = arith.addf %33, %34 : vector<16x96xf32>
    %36 = vector.extract_strided_slice %27 {offsets = [0, 0], sizes = [1, 8], strides = [1, 1]} : vector<2x8xf32> to vector<1x8xf32>
    %37 = vector.extract_strided_slice %35 {offsets = [0, 0], sizes = [8, 16], strides = [1, 1]} : vector<16x96xf32> to vector<8x16xf32>
    %38 = vector.extract_strided_slice %35 {offsets = [0, 32], sizes = [8, 16], strides = [1, 1]} : vector<16x96xf32> to vector<8x16xf32>
    %39 = vector.extract_strided_slice %35 {offsets = [0, 64], sizes = [8, 16], strides = [1, 1]} : vector<16x96xf32> to vector<8x16xf32>
    %40 = arith.truncf %37 : vector<8x16xf32> to vector<8x16xbf16>
    %41 = arith.truncf %38 : vector<8x16xf32> to vector<8x16xbf16>
    "tpu.trace_start"() <{level = 10 : i32, message = "qd,kd->qk"}> : () -> ()
    %cst_18 = arith.constant dense<0.000000e+00> : vector<8x8xf32>
    %42 = tpu.matmul %40, %41, %cst_18 {dimension_numbers = #tpu.dot_dimension_numbers<[1], [1], [0], [0], [0, 0, 1, 0], [], []>} : vector<8x16xbf16>, vector<8x16xbf16>, vector<8x8xf32> -> vector<8x8xf32>
    "tpu.trace_stop"() : () -> ()
    %cst_19 = arith.constant 2.500000e-01 : f32
    %43 = vector.broadcast %cst_19 : f32 to vector<8x8xf32>
    %44 = arith.mulf %42, %43 : vector<8x8xf32>
    %45 = vector.broadcast %36 : vector<1x8xf32> to vector<8x8xf32>
    %46 = arith.addf %44, %45 : vector<8x8xf32>
    %cst_20 = arith.constant dense<0xFF800000> : vector<8xf32>
    %47 = vector.multi_reduction <maximumf>, %46, %cst_20 [1] : vector<8x8xf32> to vector<8xf32>
    %48 = vector.shape_cast %47 : vector<8xf32> to vector<8x1xf32>
    %49 = vector.broadcast %48 : vector<8x1xf32> to vector<8x8xf32>
    %50 = arith.subf %46, %49 : vector<8x8xf32>
    %51 = math.exp %50 : vector<8x8xf32>
    %cst_21 = arith.constant dense<0.000000e+00> : vector<8xf32>
    %52 = vector.multi_reduction <add>, %51, %cst_21 [1] : vector<8x8xf32> to vector<8xf32>
    %53 = vector.shape_cast %52 : vector<8xf32> to vector<8x1xf32>
    %54 = tpu.reciprocal %53 {approx = true} : vector<8x1xf32> -> vector<8x1xf32>
    %55 = vector.broadcast %54 : vector<8x1xf32> to vector<8x8xf32>
    %56 = arith.mulf %51, %55 : vector<8x8xf32>
    %57 = arith.truncf %56 : vector<8x8xf32> to vector<8x8xbf16>
    %58 = arith.truncf %39 : vector<8x16xf32> to vector<8x16xbf16>
    "tpu.trace_start"() <{level = 10 : i32, message = "qk,kd->qd"}> : () -> ()
    %cst_22 = arith.constant dense<0.000000e+00> : vector<8x16xf32>
    %59 = tpu.matmul %57, %58, %cst_22 {dimension_numbers = #tpu.dot_dimension_numbers<[1], [0], [0], [1], [0, 0, 1, 1], [], []>} : vector<8x8xbf16>, vector<8x16xbf16>, vector<8x16xf32> -> vector<8x16xf32>
    "tpu.trace_stop"() : () -> ()
    %60 = vector.extract_strided_slice %35 {offsets = [0, 16], sizes = [8, 16], strides = [1, 1]} : vector<16x96xf32> to vector<8x16xf32>
    %61 = vector.extract_strided_slice %35 {offsets = [0, 48], sizes = [8, 16], strides = [1, 1]} : vector<16x96xf32> to vector<8x16xf32>
    %62 = vector.extract_strided_slice %35 {offsets = [0, 80], sizes = [8, 16], strides = [1, 1]} : vector<16x96xf32> to vector<8x16xf32>
    %63 = arith.truncf %60 : vector<8x16xf32> to vector<8x16xbf16>
    %64 = arith.truncf %61 : vector<8x16xf32> to vector<8x16xbf16>
    "tpu.trace_start"() <{level = 10 : i32, message = "qd,kd->qk"}> : () -> ()
    %cst_23 = arith.constant dense<0.000000e+00> : vector<8x8xf32>
    %65 = tpu.matmul %63, %64, %cst_23 {dimension_numbers = #tpu.dot_dimension_numbers<[1], [1], [0], [0], [0, 0, 1, 0], [], []>} : vector<8x16xbf16>, vector<8x16xbf16>, vector<8x8xf32> -> vector<8x8xf32>
    "tpu.trace_stop"() : () -> ()
    %cst_24 = arith.constant 2.500000e-01 : f32
    %66 = vector.broadcast %cst_24 : f32 to vector<8x8xf32>
    %67 = arith.mulf %65, %66 : vector<8x8xf32>
    %68 = vector.broadcast %36 : vector<1x8xf32> to vector<8x8xf32>
    %69 = arith.addf %67, %68 : vector<8x8xf32>
    %cst_25 = arith.constant dense<0xFF800000> : vector<8xf32>
    %70 = vector.multi_reduction <maximumf>, %69, %cst_25 [1] : vector<8x8xf32> to vector<8xf32>
    %71 = vector.shape_cast %70 : vector<8xf32> to vector<8x1xf32>
    %72 = vector.broadcast %71 : vector<8x1xf32> to vector<8x8xf32>
    %73 = arith.subf %69, %72 : vector<8x8xf32>
    %74 = math.exp %73 : vector<8x8xf32>
    %cst_26 = arith.constant dense<0.000000e+00> : vector<8xf32>
    %75 = vector.multi_reduction <add>, %74, %cst_26 [1] : vector<8x8xf32> to vector<8xf32>
    %76 = vector.shape_cast %75 : vector<8xf32> to vector<8x1xf32>
    %77 = tpu.reciprocal %76 {approx = true} : vector<8x1xf32> -> vector<8x1xf32>
    %78 = vector.broadcast %77 : vector<8x1xf32> to vector<8x8xf32>
    %79 = arith.mulf %74, %78 : vector<8x8xf32>
    %80 = arith.truncf %79 : vector<8x8xf32> to vector<8x8xbf16>
    %81 = arith.truncf %62 : vector<8x16xf32> to vector<8x16xbf16>
    "tpu.trace_start"() <{level = 10 : i32, message = "qk,kd->qd"}> : () -> ()
    %cst_27 = arith.constant dense<0.000000e+00> : vector<8x16xf32>
    %82 = tpu.matmul %80, %81, %cst_27 {dimension_numbers = #tpu.dot_dimension_numbers<[1], [0], [0], [1], [0, 0, 1, 1], [], []>} : vector<8x8xbf16>, vector<8x16xbf16>, vector<8x16xf32> -> vector<8x16xf32>
    "tpu.trace_stop"() : () -> ()
    %83 = tpu.concatenate %59, %82 in 1 : vector<8x16xf32>, vector<8x16xf32> -> vector<8x32xf32>
    %84 = vector.extract_strided_slice %27 {offsets = [1, 0], sizes = [1, 8], strides = [1, 1]} : vector<2x8xf32> to vector<1x8xf32>
    %85 = vector.extract_strided_slice %35 {offsets = [8, 0], sizes = [8, 16], strides = [1, 1]} : vector<16x96xf32> to vector<8x16xf32>
    %86 = vector.extract_strided_slice %35 {offsets = [8, 32], sizes = [8, 16], strides = [1, 1]} : vector<16x96xf32> to vector<8x16xf32>
    %87 = vector.extract_strided_slice %35 {offsets = [8, 64], sizes = [8, 16], strides = [1, 1]} : vector<16x96xf32> to vector<8x16xf32>
    %88 = arith.truncf %85 : vector<8x16xf32> to vector<8x16xbf16>
    %89 = arith.truncf %86 : vector<8x16xf32> to vector<8x16xbf16>
    "tpu.trace_start"() <{level = 10 : i32, message = "qd,kd->qk"}> : () -> ()
    %cst_28 = arith.constant dense<0.000000e+00> : vector<8x8xf32>
    %90 = tpu.matmul %88, %89, %cst_28 {dimension_numbers = #tpu.dot_dimension_numbers<[1], [1], [0], [0], [0, 0, 1, 0], [], []>} : vector<8x16xbf16>, vector<8x16xbf16>, vector<8x8xf32> -> vector<8x8xf32>
    "tpu.trace_stop"() : () -> ()
    %cst_29 = arith.constant 2.500000e-01 : f32
    %91 = vector.broadcast %cst_29 : f32 to vector<8x8xf32>
    %92 = arith.mulf %90, %91 : vector<8x8xf32>
    %93 = vector.broadcast %84 : vector<1x8xf32> to vector<8x8xf32>
    %94 = arith.addf %92, %93 : vector<8x8xf32>
    %cst_30 = arith.constant dense<0xFF800000> : vector<8xf32>
    %95 = vector.multi_reduction <maximumf>, %94, %cst_30 [1] : vector<8x8xf32> to vector<8xf32>
    %96 = vector.shape_cast %95 : vector<8xf32> to vector<8x1xf32>
    %97 = vector.broadcast %96 : vector<8x1xf32> to vector<8x8xf32>
    %98 = arith.subf %94, %97 : vector<8x8xf32>
    %99 = math.exp %98 : vector<8x8xf32>
    %cst_31 = arith.constant dense<0.000000e+00> : vector<8xf32>
    %100 = vector.multi_reduction <add>, %99, %cst_31 [1] : vector<8x8xf32> to vector<8xf32>
    %101 = vector.shape_cast %100 : vector<8xf32> to vector<8x1xf32>
    %102 = tpu.reciprocal %101 {approx = true} : vector<8x1xf32> -> vector<8x1xf32>
    %103 = vector.broadcast %102 : vector<8x1xf32> to vector<8x8xf32>
    %104 = arith.mulf %99, %103 : vector<8x8xf32>
    %105 = arith.truncf %104 : vector<8x8xf32> to vector<8x8xbf16>
    %106 = arith.truncf %87 : vector<8x16xf32> to vector<8x16xbf16>
    "tpu.trace_start"() <{level = 10 : i32, message = "qk,kd->qd"}> : () -> ()
    %cst_32 = arith.constant dense<0.000000e+00> : vector<8x16xf32>
    %107 = tpu.matmul %105, %106, %cst_32 {dimension_numbers = #tpu.dot_dimension_numbers<[1], [0], [0], [1], [0, 0, 1, 1], [], []>} : vector<8x8xbf16>, vector<8x16xbf16>, vector<8x16xf32> -> vector<8x16xf32>
    "tpu.trace_stop"() : () -> ()
    %108 = vector.extract_strided_slice %35 {offsets = [8, 16], sizes = [8, 16], strides = [1, 1]} : vector<16x96xf32> to vector<8x16xf32>
    %109 = vector.extract_strided_slice %35 {offsets = [8, 48], sizes = [8, 16], strides = [1, 1]} : vector<16x96xf32> to vector<8x16xf32>
    %110 = vector.extract_strided_slice %35 {offsets = [8, 80], sizes = [8, 16], strides = [1, 1]} : vector<16x96xf32> to vector<8x16xf32>
    %111 = arith.truncf %108 : vector<8x16xf32> to vector<8x16xbf16>
    %112 = arith.truncf %109 : vector<8x16xf32> to vector<8x16xbf16>
    "tpu.trace_start"() <{level = 10 : i32, message = "qd,kd->qk"}> : () -> ()
    %cst_33 = arith.constant dense<0.000000e+00> : vector<8x8xf32>
    %113 = tpu.matmul %111, %112, %cst_33 {dimension_numbers = #tpu.dot_dimension_numbers<[1], [1], [0], [0], [0, 0, 1, 0], [], []>} : vector<8x16xbf16>, vector<8x16xbf16>, vector<8x8xf32> -> vector<8x8xf32>
    "tpu.trace_stop"() : () -> ()
    %cst_34 = arith.constant 2.500000e-01 : f32
    %114 = vector.broadcast %cst_34 : f32 to vector<8x8xf32>
    %115 = arith.mulf %113, %114 : vector<8x8xf32>
    %116 = vector.broadcast %84 : vector<1x8xf32> to vector<8x8xf32>
    %117 = arith.addf %115, %116 : vector<8x8xf32>
    %cst_35 = arith.constant dense<0xFF800000> : vector<8xf32>
    %118 = vector.multi_reduction <maximumf>, %117, %cst_35 [1] : vector<8x8xf32> to vector<8xf32>
    %119 = vector.shape_cast %118 : vector<8xf32> to vector<8x1xf32>
    %120 = vector.broadcast %119 : vector<8x1xf32> to vector<8x8xf32>
    %121 = arith.subf %117, %120 : vector<8x8xf32>
    %122 = math.exp %121 : vector<8x8xf32>
    %cst_36 = arith.constant dense<0.000000e+00> : vector<8xf32>
    %123 = vector.multi_reduction <add>, %122, %cst_36 [1] : vector<8x8xf32> to vector<8xf32>
    %124 = vector.shape_cast %123 : vector<8xf32> to vector<8x1xf32>
    %125 = tpu.reciprocal %124 {approx = true} : vector<8x1xf32> -> vector<8x1xf32>
    %126 = vector.broadcast %125 : vector<8x1xf32> to vector<8x8xf32>
    %127 = arith.mulf %122, %126 : vector<8x8xf32>
    %128 = arith.truncf %127 : vector<8x8xf32> to vector<8x8xbf16>
    %129 = arith.truncf %110 : vector<8x16xf32> to vector<8x16xbf16>
    "tpu.trace_start"() <{level = 10 : i32, message = "qk,kd->qd"}> : () -> ()
    %cst_37 = arith.constant dense<0.000000e+00> : vector<8x16xf32>
    %130 = tpu.matmul %128, %129, %cst_37 {dimension_numbers = #tpu.dot_dimension_numbers<[1], [0], [0], [1], [0, 0, 1, 1], [], []>} : vector<8x8xbf16>, vector<8x16xbf16>, vector<8x16xf32> -> vector<8x16xf32>
    "tpu.trace_stop"() : () -> ()
    %131 = tpu.concatenate %107, %130 in 1 : vector<8x16xf32>, vector<8x16xf32> -> vector<8x32xf32>
    %132 = tpu.concatenate %83, %131 in 0 : vector<8x32xf32>, vector<8x32xf32> -> vector<16x32xf32>
    %c0_38 = arith.constant 0 : index
    %c0_39 = arith.constant 0 : index
    %c0_40 = arith.constant 0 : index
    %133 = vector.load %arg6[%c0_38, %c0_39, %c0_40] : memref<2x32x32xbf16, #tpu.memory_space<vmem>>, vector<1x32x32xbf16>
    %134 = vector.shape_cast %133 : vector<1x32x32xbf16> to vector<32x32xbf16>
    %c0_41 = arith.constant 0 : index
    %c0_42 = arith.constant 0 : index
    %c0_43 = arith.constant 0 : index
    %135 = vector.load %arg7[%c0_41, %c0_42, %c0_43] : memref<2x1x32xf32, #tpu.memory_space<vmem>>, vector<1x1x32xf32>
    %136 = vector.shape_cast %135 : vector<1x1x32xf32> to vector<1x32xf32>
    %137 = arith.truncf %132 : vector<16x32xf32> to vector<16x32xbf16>
    %cst_44 = arith.constant dense<0.000000e+00> : vector<16x32xf32>
    %138 = tpu.matmul %137, %134, %cst_44 {dimension_numbers = #tpu.dot_dimension_numbers<[1], [0], [0], [1], [0, 0, 1, 1], [], []>} : vector<16x32xbf16>, vector<32x32xbf16>, vector<16x32xf32> -> vector<16x32xf32>
    %139 = vector.broadcast %136 : vector<1x32xf32> to vector<16x32xf32>
    %140 = arith.addf %138, %139 : vector<16x32xf32>
    %141 = arith.addf %26, %140 : vector<16x32xf32>
    %c0_45 = arith.constant 0 : index
    %c0_46 = arith.constant 0 : index
    %c0_47 = arith.constant 0 : index
    %142 = vector.load %arg8[%c0_45, %c0_46, %c0_47] : memref<2x1x32xf32, #tpu.memory_space<vmem>>, vector<1x1x32xf32>
    %143 = vector.shape_cast %142 : vector<1x1x32xf32> to vector<1x32xf32>
    %c0_48 = arith.constant 0 : index
    %c0_49 = arith.constant 0 : index
    %c0_50 = arith.constant 0 : index
    %144 = vector.load %arg9[%c0_48, %c0_49, %c0_50] : memref<2x1x32xf32, #tpu.memory_space<vmem>>, vector<1x1x32xf32>
    %145 = vector.shape_cast %144 : vector<1x1x32xf32> to vector<1x32xf32>
    %cst_51 = arith.constant dense<0.000000e+00> : vector<16xf32>
    %146 = vector.multi_reduction <add>, %141, %cst_51 [1] : vector<16x32xf32> to vector<16xf32>
    %147 = vector.shape_cast %146 : vector<16xf32> to vector<16x1xf32>
    %cst_52 = arith.constant 3.200000e+01 : f32
    %148 = vector.broadcast %cst_52 : f32 to vector<16x1xf32>
    %149 = arith.divf %147, %148 : vector<16x1xf32>
    %150 = vector.broadcast %149 : vector<16x1xf32> to vector<16x32xf32>
    %151 = arith.subf %141, %150 : vector<16x32xf32>
    %152 = vector.broadcast %149 : vector<16x1xf32> to vector<16x32xf32>
    %153 = arith.subf %141, %152 : vector<16x32xf32>
    %154 = arith.mulf %151, %153 : vector<16x32xf32>
    %cst_53 = arith.constant dense<0.000000e+00> : vector<16xf32>
    %155 = vector.multi_reduction <add>, %154, %cst_53 [1] : vector<16x32xf32> to vector<16xf32>
    %156 = vector.shape_cast %155 : vector<16xf32> to vector<16x1xf32>
    %cst_54 = arith.constant 3.200000e+01 : f32
    %157 = vector.broadcast %cst_54 : f32 to vector<16x1xf32>
    %158 = arith.divf %156, %157 : vector<16x1xf32>
    %159 = vector.broadcast %149 : vector<16x1xf32> to vector<16x32xf32>
    %160 = arith.subf %141, %159 : vector<16x32xf32>
    %cst_55 = arith.constant 9.99999996E-13 : f32
    %161 = vector.broadcast %cst_55 : f32 to vector<16x1xf32>
    %162 = arith.addf %158, %161 : vector<16x1xf32>
    %163 = math.rsqrt %162 : vector<16x1xf32>
    %164 = vector.broadcast %163 : vector<16x1xf32> to vector<16x32xf32>
    %165 = arith.mulf %160, %164 : vector<16x32xf32>
    %166 = vector.broadcast %143 : vector<1x32xf32> to vector<16x32xf32>
    %167 = arith.mulf %165, %166 : vector<16x32xf32>
    %168 = vector.broadcast %145 : vector<1x32xf32> to vector<16x32xf32>
    %169 = arith.addf %167, %168 : vector<16x32xf32>
    %c0_56 = arith.constant 0 : index
    %c0_57 = arith.constant 0 : index
    %c0_58 = arith.constant 0 : index
    %170 = vector.load %arg10[%c0_56, %c0_57, %c0_58] : memref<2x32x64xbf16, #tpu.memory_space<vmem>>, vector<1x32x64xbf16>
    %171 = vector.shape_cast %170 : vector<1x32x64xbf16> to vector<32x64xbf16>
    %c0_59 = arith.constant 0 : index
    %c0_60 = arith.constant 0 : index
    %c0_61 = arith.constant 0 : index
    %172 = vector.load %arg11[%c0_59, %c0_60, %c0_61] : memref<2x1x64xf32, #tpu.memory_space<vmem>>, vector<1x1x64xf32>
    %173 = vector.shape_cast %172 : vector<1x1x64xf32> to vector<1x64xf32>
    %174 = arith.truncf %169 : vector<16x32xf32> to vector<16x32xbf16>
    %cst_62 = arith.constant dense<0.000000e+00> : vector<16x64xf32>
    %175 = tpu.matmul %174, %171, %cst_62 {dimension_numbers = #tpu.dot_dimension_numbers<[1], [0], [0], [1], [0, 0, 1, 1], [], []>} : vector<16x32xbf16>, vector<32x64xbf16>, vector<16x64xf32> -> vector<16x64xf32>
    %176 = vector.broadcast %173 : vector<1x64xf32> to vector<16x64xf32>
    %177 = arith.addf %175, %176 : vector<16x64xf32>
    %cst_63 = arith.constant 5.000000e-01 : f32
    %178 = vector.broadcast %cst_63 : f32 to vector<16x64xf32>
    %179 = arith.mulf %178, %177 : vector<16x64xf32>
    %cst_64 = arith.constant 2.000000e+00 : f32
    %180 = math.sqrt %cst_64 : f32
    %181 = vector.broadcast %180 : f32 to vector<16x64xf32>
    %182 = arith.divf %177, %181 : vector<16x64xf32>
    %183 = math.erf %182 : vector<16x64xf32>
    %cst_65 = arith.constant 1.000000e+00 : f32
    %184 = vector.broadcast %cst_65 : f32 to vector<16x64xf32>
    %185 = arith.addf %184, %183 : vector<16x64xf32>
    %186 = arith.mulf %179, %185 : vector<16x64xf32>
    %c0_66 = arith.constant 0 : index
    %c0_67 = arith.constant 0 : index
    %c0_68 = arith.constant 0 : index
    %187 = vector.load %arg12[%c0_66, %c0_67, %c0_68] : memref<2x64x32xbf16, #tpu.memory_space<vmem>>, vector<1x64x32xbf16>
    %188 = vector.shape_cast %187 : vector<1x64x32xbf16> to vector<64x32xbf16>
    %c0_69 = arith.constant 0 : index
    %c0_70 = arith.constant 0 : index
    %c0_71 = arith.constant 0 : index
    %189 = vector.load %arg13[%c0_69, %c0_70, %c0_71] : memref<2x1x32xf32, #tpu.memory_space<vmem>>, vector<1x1x32xf32>
    %190 = vector.shape_cast %189 : vector<1x1x32xf32> to vector<1x32xf32>
    %191 = arith.truncf %186 : vector<16x64xf32> to vector<16x64xbf16>
    %cst_72 = arith.constant dense<0.000000e+00> : vector<16x32xf32>
    %192 = tpu.matmul %191, %188, %cst_72 {dimension_numbers = #tpu.dot_dimension_numbers<[1], [0], [0], [1], [0, 0, 1, 1], [], []>} : vector<16x64xbf16>, vector<64x32xbf16>, vector<16x32xf32> -> vector<16x32xf32>
    %193 = vector.broadcast %190 : vector<1x32xf32> to vector<16x32xf32>
    %194 = arith.addf %192, %193 : vector<16x32xf32>
    %195 = arith.addf %169, %194 : vector<16x32xf32>
    %c0_73 = arith.constant 0 : index
    %c0_74 = arith.constant 0 : index
    %c0_75 = arith.constant 0 : index
    %196 = vector.load %arg14[%c0_73, %c0_74, %c0_75] : memref<2x1x32xf32, #tpu.memory_space<vmem>>, vector<1x1x32xf32>
    %197 = vector.shape_cast %196 : vector<1x1x32xf32> to vector<1x32xf32>
    %c0_76 = arith.constant 0 : index
    %c0_77 = arith.constant 0 : index
    %c0_78 = arith.constant 0 : index
    %198 = vector.load %arg15[%c0_76, %c0_77, %c0_78] : memref<2x1x32xf32, #tpu.memory_space<vmem>>, vector<1x1x32xf32>
    %199 = vector.shape_cast %198 : vector<1x1x32xf32> to vector<1x32xf32>
    %cst_79 = arith.constant dense<0.000000e+00> : vector<16xf32>
    %200 = vector.multi_reduction <add>, %195, %cst_79 [1] : vector<16x32xf32> to vector<16xf32>
    %201 = vector.shape_cast %200 : vector<16xf32> to vector<16x1xf32>
    %cst_80 = arith.constant 3.200000e+01 : f32
    %202 = vector.broadcast %cst_80 : f32 to vector<16x1xf32>
    %203 = arith.divf %201, %202 : vector<16x1xf32>
    %204 = vector.broadcast %203 : vector<16x1xf32> to vector<16x32xf32>
    %205 = arith.subf %195, %204 : vector<16x32xf32>
    %206 = vector.broadcast %203 : vector<16x1xf32> to vector<16x32xf32>
    %207 = arith.subf %195, %206 : vector<16x32xf32>
    %208 = arith.mulf %205, %207 : vector<16x32xf32>
    %cst_81 = arith.constant dense<0.000000e+00> : vector<16xf32>
    %209 = vector.multi_reduction <add>, %208, %cst_81 [1] : vector<16x32xf32> to vector<16xf32>
    %210 = vector.shape_cast %209 : vector<16xf32> to vector<16x1xf32>
    %cst_82 = arith.constant 3.200000e+01 : f32
    %211 = vector.broadcast %cst_82 : f32 to vector<16x1xf32>
    %212 = arith.divf %210, %211 : vector<16x1xf32>
    %213 = vector.broadcast %203 : vector<16x1xf32> to vector<16x32xf32>
    %214 = arith.subf %195, %213 : vector<16x32xf32>
    %cst_83 = arith.constant 9.99999996E-13 : f32
    %215 = vector.broadcast %cst_83 : f32 to vector<16x1xf32>
    %216 = arith.addf %212, %215 : vector<16x1xf32>
    %217 = math.rsqrt %216 : vector<16x1xf32>
    %218 = vector.broadcast %217 : vector<16x1xf32> to vector<16x32xf32>
    %219 = arith.mulf %214, %218 : vector<16x32xf32>
    %220 = vector.broadcast %197 : vector<1x32xf32> to vector<16x32xf32>
    %221 = arith.mulf %219, %220 : vector<16x32xf32>
    %222 = vector.broadcast %199 : vector<1x32xf32> to vector<16x32xf32>
    %223 = arith.addf %221, %222 : vector<16x32xf32>
    %c1 = arith.constant 1 : index
    %c0_84 = arith.constant 0 : index
    %c0_85 = arith.constant 0 : index
    %224 = vector.load %arg4[%c1, %c0_84, %c0_85] : memref<2x32x96xbf16, #tpu.memory_space<vmem>>, vector<1x32x96xbf16>
    %225 = vector.shape_cast %224 : vector<1x32x96xbf16> to vector<32x96xbf16>
    %c1_86 = arith.constant 1 : index
    %c0_87 = arith.constant 0 : index
    %c0_88 = arith.constant 0 : index
    %226 = vector.load %arg5[%c1_86, %c0_87, %c0_88] : memref<2x1x96xf32, #tpu.memory_space<vmem>>, vector<1x1x96xf32>
    %227 = vector.shape_cast %226 : vector<1x1x96xf32> to vector<1x96xf32>
    %228 = arith.truncf %223 : vector<16x32xf32> to vector<16x32xbf16>
    %cst_89 = arith.constant dense<0.000000e+00> : vector<16x96xf32>
    %229 = tpu.matmul %228, %225, %cst_89 {dimension_numbers = #tpu.dot_dimension_numbers<[1], [0], [0], [1], [0, 0, 1, 1], [], []>} : vector<16x32xbf16>, vector<32x96xbf16>, vector<16x96xf32> -> vector<16x96xf32>
    %230 = vector.broadcast %227 : vector<1x96xf32> to vector<16x96xf32>
    %231 = arith.addf %229, %230 : vector<16x96xf32>
    %232 = vector.extract_strided_slice %27 {offsets = [0, 0], sizes = [1, 8], strides = [1, 1]} : vector<2x8xf32> to vector<1x8xf32>
    %233 = vector.extract_strided_slice %231 {offsets = [0, 0], sizes = [8, 16], strides = [1, 1]} : vector<16x96xf32> to vector<8x16xf32>
    %234 = vector.extract_strided_slice %231 {offsets = [0, 32], sizes = [8, 16], strides = [1, 1]} : vector<16x96xf32> to vector<8x16xf32>
    %235 = vector.extract_strided_slice %231 {offsets = [0, 64], sizes = [8, 16], strides = [1, 1]} : vector<16x96xf32> to vector<8x16xf32>
    %236 = arith.truncf %233 : vector<8x16xf32> to vector<8x16xbf16>
    %237 = arith.truncf %234 : vector<8x16xf32> to vector<8x16xbf16>
    "tpu.trace_start"() <{level = 10 : i32, message = "qd,kd->qk"}> : () -> ()
    %cst_90 = arith.constant dense<0.000000e+00> : vector<8x8xf32>
    %238 = tpu.matmul %236, %237, %cst_90 {dimension_numbers = #tpu.dot_dimension_numbers<[1], [1], [0], [0], [0, 0, 1, 0], [], []>} : vector<8x16xbf16>, vector<8x16xbf16>, vector<8x8xf32> -> vector<8x8xf32>
    "tpu.trace_stop"() : () -> ()
    %cst_91 = arith.constant 2.500000e-01 : f32
    %239 = vector.broadcast %cst_91 : f32 to vector<8x8xf32>
    %240 = arith.mulf %238, %239 : vector<8x8xf32>
    %241 = vector.broadcast %232 : vector<1x8xf32> to vector<8x8xf32>
    %242 = arith.addf %240, %241 : vector<8x8xf32>
    %cst_92 = arith.constant dense<0xFF800000> : vector<8xf32>
    %243 = vector.multi_reduction <maximumf>, %242, %cst_92 [1] : vector<8x8xf32> to vector<8xf32>
    %244 = vector.shape_cast %243 : vector<8xf32> to vector<8x1xf32>
    %245 = vector.broadcast %244 : vector<8x1xf32> to vector<8x8xf32>
    %246 = arith.subf %242, %245 : vector<8x8xf32>
    %247 = math.exp %246 : vector<8x8xf32>
    %cst_93 = arith.constant dense<0.000000e+00> : vector<8xf32>
    %248 = vector.multi_reduction <add>, %247, %cst_93 [1] : vector<8x8xf32> to vector<8xf32>
    %249 = vector.shape_cast %248 : vector<8xf32> to vector<8x1xf32>
    %250 = tpu.reciprocal %249 {approx = true} : vector<8x1xf32> -> vector<8x1xf32>
    %251 = vector.broadcast %250 : vector<8x1xf32> to vector<8x8xf32>
    %252 = arith.mulf %247, %251 : vector<8x8xf32>
    %253 = arith.truncf %252 : vector<8x8xf32> to vector<8x8xbf16>
    %254 = arith.truncf %235 : vector<8x16xf32> to vector<8x16xbf16>
    "tpu.trace_start"() <{level = 10 : i32, message = "qk,kd->qd"}> : () -> ()
    %cst_94 = arith.constant dense<0.000000e+00> : vector<8x16xf32>
    %255 = tpu.matmul %253, %254, %cst_94 {dimension_numbers = #tpu.dot_dimension_numbers<[1], [0], [0], [1], [0, 0, 1, 1], [], []>} : vector<8x8xbf16>, vector<8x16xbf16>, vector<8x16xf32> -> vector<8x16xf32>
    "tpu.trace_stop"() : () -> ()
    %256 = vector.extract_strided_slice %231 {offsets = [0, 16], sizes = [8, 16], strides = [1, 1]} : vector<16x96xf32> to vector<8x16xf32>
    %257 = vector.extract_strided_slice %231 {offsets = [0, 48], sizes = [8, 16], strides = [1, 1]} : vector<16x96xf32> to vector<8x16xf32>
    %258 = vector.extract_strided_slice %231 {offsets = [0, 80], sizes = [8, 16], strides = [1, 1]} : vector<16x96xf32> to vector<8x16xf32>
    %259 = arith.truncf %256 : vector<8x16xf32> to vector<8x16xbf16>
    %260 = arith.truncf %257 : vector<8x16xf32> to vector<8x16xbf16>
    "tpu.trace_start"() <{level = 10 : i32, message = "qd,kd->qk"}> : () -> ()
    %cst_95 = arith.constant dense<0.000000e+00> : vector<8x8xf32>
    %261 = tpu.matmul %259, %260, %cst_95 {dimension_numbers = #tpu.dot_dimension_numbers<[1], [1], [0], [0], [0, 0, 1, 0], [], []>} : vector<8x16xbf16>, vector<8x16xbf16>, vector<8x8xf32> -> vector<8x8xf32>
    "tpu.trace_stop"() : () -> ()
    %cst_96 = arith.constant 2.500000e-01 : f32
    %262 = vector.broadcast %cst_96 : f32 to vector<8x8xf32>
    %263 = arith.mulf %261, %262 : vector<8x8xf32>
    %264 = vector.broadcast %232 : vector<1x8xf32> to vector<8x8xf32>
    %265 = arith.addf %263, %264 : vector<8x8xf32>
    %cst_97 = arith.constant dense<0xFF800000> : vector<8xf32>
    %266 = vector.multi_reduction <maximumf>, %265, %cst_97 [1] : vector<8x8xf32> to vector<8xf32>
    %267 = vector.shape_cast %266 : vector<8xf32> to vector<8x1xf32>
    %268 = vector.broadcast %267 : vector<8x1xf32> to vector<8x8xf32>
    %269 = arith.subf %265, %268 : vector<8x8xf32>
    %270 = math.exp %269 : vector<8x8xf32>
    %cst_98 = arith.constant dense<0.000000e+00> : vector<8xf32>
    %271 = vector.multi_reduction <add>, %270, %cst_98 [1] : vector<8x8xf32> to vector<8xf32>
    %272 = vector.shape_cast %271 : vector<8xf32> to vector<8x1xf32>
    %273 = tpu.reciprocal %272 {approx = true} : vector<8x1xf32> -> vector<8x1xf32>
    %274 = vector.broadcast %273 : vector<8x1xf32> to vector<8x8xf32>
    %275 = arith.mulf %270, %274 : vector<8x8xf32>
    %276 = arith.truncf %275 : vector<8x8xf32> to vector<8x8xbf16>
    %277 = arith.truncf %258 : vector<8x16xf32> to vector<8x16xbf16>
    "tpu.trace_start"() <{level = 10 : i32, message = "qk,kd->qd"}> : () -> ()
    %cst_99 = arith.constant dense<0.000000e+00> : vector<8x16xf32>
    %278 = tpu.matmul %276, %277, %cst_99 {dimension_numbers = #tpu.dot_dimension_numbers<[1], [0], [0], [1], [0, 0, 1, 1], [], []>} : vector<8x8xbf16>, vector<8x16xbf16>, vector<8x16xf32> -> vector<8x16xf32>
    "tpu.trace_stop"() : () -> ()
    %279 = tpu.concatenate %255, %278 in 1 : vector<8x16xf32>, vector<8x16xf32> -> vector<8x32xf32>
    %280 = vector.extract_strided_slice %27 {offsets = [1, 0], sizes = [1, 8], strides = [1, 1]} : vector<2x8xf32> to vector<1x8xf32>
    %281 = vector.extract_strided_slice %231 {offsets = [8, 0], sizes = [8, 16], strides = [1, 1]} : vector<16x96xf32> to vector<8x16xf32>
    %282 = vector.extract_strided_slice %231 {offsets = [8, 32], sizes = [8, 16], strides = [1, 1]} : vector<16x96xf32> to vector<8x16xf32>
    %283 = vector.extract_strided_slice %231 {offsets = [8, 64], sizes = [8, 16], strides = [1, 1]} : vector<16x96xf32> to vector<8x16xf32>
    %284 = arith.truncf %281 : vector<8x16xf32> to vector<8x16xbf16>
    %285 = arith.truncf %282 : vector<8x16xf32> to vector<8x16xbf16>
    "tpu.trace_start"() <{level = 10 : i32, message = "qd,kd->qk"}> : () -> ()
    %cst_100 = arith.constant dense<0.000000e+00> : vector<8x8xf32>
    %286 = tpu.matmul %284, %285, %cst_100 {dimension_numbers = #tpu.dot_dimension_numbers<[1], [1], [0], [0], [0, 0, 1, 0], [], []>} : vector<8x16xbf16>, vector<8x16xbf16>, vector<8x8xf32> -> vector<8x8xf32>
    "tpu.trace_stop"() : () -> ()
    %cst_101 = arith.constant 2.500000e-01 : f32
    %287 = vector.broadcast %cst_101 : f32 to vector<8x8xf32>
    %288 = arith.mulf %286, %287 : vector<8x8xf32>
    %289 = vector.broadcast %280 : vector<1x8xf32> to vector<8x8xf32>
    %290 = arith.addf %288, %289 : vector<8x8xf32>
    %cst_102 = arith.constant dense<0xFF800000> : vector<8xf32>
    %291 = vector.multi_reduction <maximumf>, %290, %cst_102 [1] : vector<8x8xf32> to vector<8xf32>
    %292 = vector.shape_cast %291 : vector<8xf32> to vector<8x1xf32>
    %293 = vector.broadcast %292 : vector<8x1xf32> to vector<8x8xf32>
    %294 = arith.subf %290, %293 : vector<8x8xf32>
    %295 = math.exp %294 : vector<8x8xf32>
    %cst_103 = arith.constant dense<0.000000e+00> : vector<8xf32>
    %296 = vector.multi_reduction <add>, %295, %cst_103 [1] : vector<8x8xf32> to vector<8xf32>
    %297 = vector.shape_cast %296 : vector<8xf32> to vector<8x1xf32>
    %298 = tpu.reciprocal %297 {approx = true} : vector<8x1xf32> -> vector<8x1xf32>
    %299 = vector.broadcast %298 : vector<8x1xf32> to vector<8x8xf32>
    %300 = arith.mulf %295, %299 : vector<8x8xf32>
    %301 = arith.truncf %300 : vector<8x8xf32> to vector<8x8xbf16>
    %302 = arith.truncf %283 : vector<8x16xf32> to vector<8x16xbf16>
    "tpu.trace_start"() <{level = 10 : i32, message = "qk,kd->qd"}> : () -> ()
    %cst_104 = arith.constant dense<0.000000e+00> : vector<8x16xf32>
    %303 = tpu.matmul %301, %302, %cst_104 {dimension_numbers = #tpu.dot_dimension_numbers<[1], [0], [0], [1], [0, 0, 1, 1], [], []>} : vector<8x8xbf16>, vector<8x16xbf16>, vector<8x16xf32> -> vector<8x16xf32>
    "tpu.trace_stop"() : () -> ()
    %304 = vector.extract_strided_slice %231 {offsets = [8, 16], sizes = [8, 16], strides = [1, 1]} : vector<16x96xf32> to vector<8x16xf32>
    %305 = vector.extract_strided_slice %231 {offsets = [8, 48], sizes = [8, 16], strides = [1, 1]} : vector<16x96xf32> to vector<8x16xf32>
    %306 = vector.extract_strided_slice %231 {offsets = [8, 80], sizes = [8, 16], strides = [1, 1]} : vector<16x96xf32> to vector<8x16xf32>
    %307 = arith.truncf %304 : vector<8x16xf32> to vector<8x16xbf16>
    %308 = arith.truncf %305 : vector<8x16xf32> to vector<8x16xbf16>
    "tpu.trace_start"() <{level = 10 : i32, message = "qd,kd->qk"}> : () -> ()
    %cst_105 = arith.constant dense<0.000000e+00> : vector<8x8xf32>
    %309 = tpu.matmul %307, %308, %cst_105 {dimension_numbers = #tpu.dot_dimension_numbers<[1], [1], [0], [0], [0, 0, 1, 0], [], []>} : vector<8x16xbf16>, vector<8x16xbf16>, vector<8x8xf32> -> vector<8x8xf32>
    "tpu.trace_stop"() : () -> ()
    %cst_106 = arith.constant 2.500000e-01 : f32
    %310 = vector.broadcast %cst_106 : f32 to vector<8x8xf32>
    %311 = arith.mulf %309, %310 : vector<8x8xf32>
    %312 = vector.broadcast %280 : vector<1x8xf32> to vector<8x8xf32>
    %313 = arith.addf %311, %312 : vector<8x8xf32>
    %cst_107 = arith.constant dense<0xFF800000> : vector<8xf32>
    %314 = vector.multi_reduction <maximumf>, %313, %cst_107 [1] : vector<8x8xf32> to vector<8xf32>
    %315 = vector.shape_cast %314 : vector<8xf32> to vector<8x1xf32>
    %316 = vector.broadcast %315 : vector<8x1xf32> to vector<8x8xf32>
    %317 = arith.subf %313, %316 : vector<8x8xf32>
    %318 = math.exp %317 : vector<8x8xf32>
    %cst_108 = arith.constant dense<0.000000e+00> : vector<8xf32>
    %319 = vector.multi_reduction <add>, %318, %cst_108 [1] : vector<8x8xf32> to vector<8xf32>
    %320 = vector.shape_cast %319 : vector<8xf32> to vector<8x1xf32>
    %321 = tpu.reciprocal %320 {approx = true} : vector<8x1xf32> -> vector<8x1xf32>
    %322 = vector.broadcast %321 : vector<8x1xf32> to vector<8x8xf32>
    %323 = arith.mulf %318, %322 : vector<8x8xf32>
    %324 = arith.truncf %323 : vector<8x8xf32> to vector<8x8xbf16>
    %325 = arith.truncf %306 : vector<8x16xf32> to vector<8x16xbf16>
    "tpu.trace_start"() <{level = 10 : i32, message = "qk,kd->qd"}> : () -> ()
    %cst_109 = arith.constant dense<0.000000e+00> : vector<8x16xf32>
    %326 = tpu.matmul %324, %325, %cst_109 {dimension_numbers = #tpu.dot_dimension_numbers<[1], [0], [0], [1], [0, 0, 1, 1], [], []>} : vector<8x8xbf16>, vector<8x16xbf16>, vector<8x16xf32> -> vector<8x16xf32>
    "tpu.trace_stop"() : () -> ()
    %327 = tpu.concatenate %303, %326 in 1 : vector<8x16xf32>, vector<8x16xf32> -> vector<8x32xf32>
    %328 = tpu.concatenate %279, %327 in 0 : vector<8x32xf32>, vector<8x32xf32> -> vector<16x32xf32>
    %c1_110 = arith.constant 1 : index
    %c0_111 = arith.constant 0 : index
    %c0_112 = arith.constant 0 : index
    %329 = vector.load %arg6[%c1_110, %c0_111, %c0_112] : memref<2x32x32xbf16, #tpu.memory_space<vmem>>, vector<1x32x32xbf16>
    %330 = vector.shape_cast %329 : vector<1x32x32xbf16> to vector<32x32xbf16>
    %c1_113 = arith.constant 1 : index
    %c0_114 = arith.constant 0 : index
    %c0_115 = arith.constant 0 : index
    %331 = vector.load %arg7[%c1_113, %c0_114, %c0_115] : memref<2x1x32xf32, #tpu.memory_space<vmem>>, vector<1x1x32xf32>
    %332 = vector.shape_cast %331 : vector<1x1x32xf32> to vector<1x32xf32>
    %333 = arith.truncf %328 : vector<16x32xf32> to vector<16x32xbf16>
    %cst_116 = arith.constant dense<0.000000e+00> : vector<16x32xf32>
    %334 = tpu.matmul %333, %330, %cst_116 {dimension_numbers = #tpu.dot_dimension_numbers<[1], [0], [0], [1], [0, 0, 1, 1], [], []>} : vector<16x32xbf16>, vector<32x32xbf16>, vector<16x32xf32> -> vector<16x32xf32>
    %335 = vector.broadcast %332 : vector<1x32xf32> to vector<16x32xf32>
    %336 = arith.addf %334, %335 : vector<16x32xf32>
    %337 = arith.addf %223, %336 : vector<16x32xf32>
    %c1_117 = arith.constant 1 : index
    %c0_118 = arith.constant 0 : index
    %c0_119 = arith.constant 0 : index
    %338 = vector.load %arg8[%c1_117, %c0_118, %c0_119] : memref<2x1x32xf32, #tpu.memory_space<vmem>>, vector<1x1x32xf32>
    %339 = vector.shape_cast %338 : vector<1x1x32xf32> to vector<1x32xf32>
    %c1_120 = arith.constant 1 : index
    %c0_121 = arith.constant 0 : index
    %c0_122 = arith.constant 0 : index
    %340 = vector.load %arg9[%c1_120, %c0_121, %c0_122] : memref<2x1x32xf32, #tpu.memory_space<vmem>>, vector<1x1x32xf32>
    %341 = vector.shape_cast %340 : vector<1x1x32xf32> to vector<1x32xf32>
    %cst_123 = arith.constant dense<0.000000e+00> : vector<16xf32>
    %342 = vector.multi_reduction <add>, %337, %cst_123 [1] : vector<16x32xf32> to vector<16xf32>
    %343 = vector.shape_cast %342 : vector<16xf32> to vector<16x1xf32>
    %cst_124 = arith.constant 3.200000e+01 : f32
    %344 = vector.broadcast %cst_124 : f32 to vector<16x1xf32>
    %345 = arith.divf %343, %344 : vector<16x1xf32>
    %346 = vector.broadcast %345 : vector<16x1xf32> to vector<16x32xf32>
    %347 = arith.subf %337, %346 : vector<16x32xf32>
    %348 = vector.broadcast %345 : vector<16x1xf32> to vector<16x32xf32>
    %349 = arith.subf %337, %348 : vector<16x32xf32>
    %350 = arith.mulf %347, %349 : vector<16x32xf32>
    %cst_125 = arith.constant dense<0.000000e+00> : vector<16xf32>
    %351 = vector.multi_reduction <add>, %350, %cst_125 [1] : vector<16x32xf32> to vector<16xf32>
    %352 = vector.shape_cast %351 : vector<16xf32> to vector<16x1xf32>
    %cst_126 = arith.constant 3.200000e+01 : f32
    %353 = vector.broadcast %cst_126 : f32 to vector<16x1xf32>
    %354 = arith.divf %352, %353 : vector<16x1xf32>
    %355 = vector.broadcast %345 : vector<16x1xf32> to vector<16x32xf32>
    %356 = arith.subf %337, %355 : vector<16x32xf32>
    %cst_127 = arith.constant 9.99999996E-13 : f32
    %357 = vector.broadcast %cst_127 : f32 to vector<16x1xf32>
    %358 = arith.addf %354, %357 : vector<16x1xf32>
    %359 = math.rsqrt %358 : vector<16x1xf32>
    %360 = vector.broadcast %359 : vector<16x1xf32> to vector<16x32xf32>
    %361 = arith.mulf %356, %360 : vector<16x32xf32>
    %362 = vector.broadcast %339 : vector<1x32xf32> to vector<16x32xf32>
    %363 = arith.mulf %361, %362 : vector<16x32xf32>
    %364 = vector.broadcast %341 : vector<1x32xf32> to vector<16x32xf32>
    %365 = arith.addf %363, %364 : vector<16x32xf32>
    %c1_128 = arith.constant 1 : index
    %c0_129 = arith.constant 0 : index
    %c0_130 = arith.constant 0 : index
    %366 = vector.load %arg10[%c1_128, %c0_129, %c0_130] : memref<2x32x64xbf16, #tpu.memory_space<vmem>>, vector<1x32x64xbf16>
    %367 = vector.shape_cast %366 : vector<1x32x64xbf16> to vector<32x64xbf16>
    %c1_131 = arith.constant 1 : index
    %c0_132 = arith.constant 0 : index
    %c0_133 = arith.constant 0 : index
    %368 = vector.load %arg11[%c1_131, %c0_132, %c0_133] : memref<2x1x64xf32, #tpu.memory_space<vmem>>, vector<1x1x64xf32>
    %369 = vector.shape_cast %368 : vector<1x1x64xf32> to vector<1x64xf32>
    %370 = arith.truncf %365 : vector<16x32xf32> to vector<16x32xbf16>
    %cst_134 = arith.constant dense<0.000000e+00> : vector<16x64xf32>
    %371 = tpu.matmul %370, %367, %cst_134 {dimension_numbers = #tpu.dot_dimension_numbers<[1], [0], [0], [1], [0, 0, 1, 1], [], []>} : vector<16x32xbf16>, vector<32x64xbf16>, vector<16x64xf32> -> vector<16x64xf32>
    %372 = vector.broadcast %369 : vector<1x64xf32> to vector<16x64xf32>
    %373 = arith.addf %371, %372 : vector<16x64xf32>
    %cst_135 = arith.constant 5.000000e-01 : f32
    %374 = vector.broadcast %cst_135 : f32 to vector<16x64xf32>
    %375 = arith.mulf %374, %373 : vector<16x64xf32>
    %cst_136 = arith.constant 2.000000e+00 : f32
    %376 = math.sqrt %cst_136 : f32
    %377 = vector.broadcast %376 : f32 to vector<16x64xf32>
    %378 = arith.divf %373, %377 : vector<16x64xf32>
    %379 = math.erf %378 : vector<16x64xf32>
    %cst_137 = arith.constant 1.000000e+00 : f32
    %380 = vector.broadcast %cst_137 : f32 to vector<16x64xf32>
    %381 = arith.addf %380, %379 : vector<16x64xf32>
    %382 = arith.mulf %375, %381 : vector<16x64xf32>
    %c1_138 = arith.constant 1 : index
    %c0_139 = arith.constant 0 : index
    %c0_140 = arith.constant 0 : index
    %383 = vector.load %arg12[%c1_138, %c0_139, %c0_140] : memref<2x64x32xbf16, #tpu.memory_space<vmem>>, vector<1x64x32xbf16>
    %384 = vector.shape_cast %383 : vector<1x64x32xbf16> to vector<64x32xbf16>
    %c1_141 = arith.constant 1 : index
    %c0_142 = arith.constant 0 : index
    %c0_143 = arith.constant 0 : index
    %385 = vector.load %arg13[%c1_141, %c0_142, %c0_143] : memref<2x1x32xf32, #tpu.memory_space<vmem>>, vector<1x1x32xf32>
    %386 = vector.shape_cast %385 : vector<1x1x32xf32> to vector<1x32xf32>
    %387 = arith.truncf %382 : vector<16x64xf32> to vector<16x64xbf16>
    %cst_144 = arith.constant dense<0.000000e+00> : vector<16x32xf32>
    %388 = tpu.matmul %387, %384, %cst_144 {dimension_numbers = #tpu.dot_dimension_numbers<[1], [0], [0], [1], [0, 0, 1, 1], [], []>} : vector<16x64xbf16>, vector<64x32xbf16>, vector<16x32xf32> -> vector<16x32xf32>
    %389 = vector.broadcast %386 : vector<1x32xf32> to vector<16x32xf32>
    %390 = arith.addf %388, %389 : vector<16x32xf32>
    %391 = arith.addf %365, %390 : vector<16x32xf32>
    %c1_145 = arith.constant 1 : index
    %c0_146 = arith.constant 0 : index
    %c0_147 = arith.constant 0 : index
    %392 = vector.load %arg14[%c1_145, %c0_146, %c0_147] : memref<2x1x32xf32, #tpu.memory_space<vmem>>, vector<1x1x32xf32>
    %393 = vector.shape_cast %392 : vector<1x1x32xf32> to vector<1x32xf32>
    %c1_148 = arith.constant 1 : index
    %c0_149 = arith.constant 0 : index
    %c0_150 = arith.constant 0 : index
    %394 = vector.load %arg15[%c1_148, %c0_149, %c0_150] : memref<2x1x32xf32, #tpu.memory_space<vmem>>, vector<1x1x32xf32>
    %395 = vector.shape_cast %394 : vector<1x1x32xf32> to vector<1x32xf32>
    %cst_151 = arith.constant dense<0.000000e+00> : vector<16xf32>
    %396 = vector.multi_reduction <add>, %391, %cst_151 [1] : vector<16x32xf32> to vector<16xf32>
    %397 = vector.shape_cast %396 : vector<16xf32> to vector<16x1xf32>
    %cst_152 = arith.constant 3.200000e+01 : f32
    %398 = vector.broadcast %cst_152 : f32 to vector<16x1xf32>
    %399 = arith.divf %397, %398 : vector<16x1xf32>
    %400 = vector.broadcast %399 : vector<16x1xf32> to vector<16x32xf32>
    %401 = arith.subf %391, %400 : vector<16x32xf32>
    %402 = vector.broadcast %399 : vector<16x1xf32> to vector<16x32xf32>
    %403 = arith.subf %391, %402 : vector<16x32xf32>
    %404 = arith.mulf %401, %403 : vector<16x32xf32>
    %cst_153 = arith.constant dense<0.000000e+00> : vector<16xf32>
    %405 = vector.multi_reduction <add>, %404, %cst_153 [1] : vector<16x32xf32> to vector<16xf32>
    %406 = vector.shape_cast %405 : vector<16xf32> to vector<16x1xf32>
    %cst_154 = arith.constant 3.200000e+01 : f32
    %407 = vector.broadcast %cst_154 : f32 to vector<16x1xf32>
    %408 = arith.divf %406, %407 : vector<16x1xf32>
    %409 = vector.broadcast %399 : vector<16x1xf32> to vector<16x32xf32>
    %410 = arith.subf %391, %409 : vector<16x32xf32>
    %cst_155 = arith.constant 9.99999996E-13 : f32
    %411 = vector.broadcast %cst_155 : f32 to vector<16x1xf32>
    %412 = arith.addf %408, %411 : vector<16x1xf32>
    %413 = math.rsqrt %412 : vector<16x1xf32>
    %414 = vector.broadcast %413 : vector<16x1xf32> to vector<16x32xf32>
    %415 = arith.mulf %410, %414 : vector<16x32xf32>
    %416 = vector.broadcast %393 : vector<1x32xf32> to vector<16x32xf32>
    %417 = arith.mulf %415, %416 : vector<16x32xf32>
    %418 = vector.broadcast %395 : vector<1x32xf32> to vector<16x32xf32>
    %419 = arith.addf %417, %418 : vector<16x32xf32>
    %420 = vector.extract_strided_slice %419 {offsets = [0, 0], sizes = [1, 32], strides = [1, 1]} : vector<16x32xf32> to vector<1x32xf32>
    %421 = vector.extract_strided_slice %419 {offsets = [8, 0], sizes = [1, 32], strides = [1, 1]} : vector<16x32xf32> to vector<1x32xf32>
    %422 = tpu.concatenate %420, %421 in 0 : vector<1x32xf32>, vector<1x32xf32> -> vector<2x32xf32>
    %c0_156 = arith.constant 0 : index
    %c0_157 = arith.constant 0 : index
    %423 = vector.load %arg16[%c0_156, %c0_157] : memref<32x32xbf16, #tpu.memory_space<vmem>>, vector<32x32xbf16>
    %c0_158 = arith.constant 0 : index
    %c0_159 = arith.constant 0 : index
    %424 = vector.load %arg17[%c0_158, %c0_159] : memref<1x32xf32, #tpu.memory_space<vmem>>, vector<1x32xf32>
    %425 = arith.truncf %422 : vector<2x32xf32> to vector<2x32xbf16>
    %cst_160 = arith.constant dense<0.000000e+00> : vector<2x32xf32>
    %426 = tpu.matmul %425, %423, %cst_160 {dimension_numbers = #tpu.dot_dimension_numbers<[1], [0], [0], [1], [0, 0, 1, 1], [], []>} : vector<2x32xbf16>, vector<32x32xbf16>, vector<2x32xf32> -> vector<2x32xf32>
    %427 = vector.broadcast %424 : vector<1x32xf32> to vector<2x32xf32>
    %428 = arith.addf %426, %427 : vector<2x32xf32>
    %429 = math.tanh %428 : vector<2x32xf32>
    %c0_161 = arith.constant 0 : index
    %c0_162 = arith.constant 0 : index
    %430 = vector.load %arg18[%c0_161, %c0_162] : memref<32x128xbf16, #tpu.memory_space<vmem>>, vector<32x128xbf16>
    %c0_163 = arith.constant 0 : index
    %c0_164 = arith.constant 0 : index
    %431 = vector.load %arg19[%c0_163, %c0_164] : memref<1x128xf32, #tpu.memory_space<vmem>>, vector<1x128xf32>
    %432 = arith.truncf %429 : vector<2x32xf32> to vector<2x32xbf16>
    %cst_165 = arith.constant dense<0.000000e+00> : vector<2x128xf32>
    %433 = tpu.matmul %432, %430, %cst_165 {dimension_numbers = #tpu.dot_dimension_numbers<[1], [0], [0], [1], [0, 0, 1, 1], [], []>} : vector<2x32xbf16>, vector<32x128xbf16>, vector<2x128xf32> -> vector<2x128xf32>
    %434 = vector.broadcast %431 : vector<1x128xf32> to vector<2x128xf32>
    %435 = arith.addf %433, %434 : vector<2x128xf32>
    %c0_166 = arith.constant 0 : index
    %c0_167 = arith.constant 0 : index
    %436 = vector.load %arg20[%c0_166, %c0_167] : memref<2x128xf32, #tpu.memory_space<vmem>>, vector<2x128xf32>
    tpu.vector_store %arg20[%c0_166, %c0_167], %435 {strides = array<i32>} : memref<2x128xf32, #tpu.memory_space<vmem>>, vector<2x128xf32>,
    return
  }
}

</mosaic_0001>

<bundles_post_ra>
// kernel: bert_sentiment_forward.1
= control target key start
LH: loop header
LB: loop body
LE: loop exit
PB: predicated region body
PF: predicated region fallthrough
CT: control target
= control target key end

     0   :  { %s2981_s0 = inlined_call_operand.vmem [shape: f32[16,32], index: 0, kind: input, shape index: {}]   ;;  %s2982_s1 = inlined_call_operand.vmem [shape: f32[2,8], index: 1, kind: input, shape index: {}]   ;;  %s2983_s2 = inlined_call_operand.vmem [shape: f32[1,32], index: 2, kind: input, shape index: {}]   ;;  %s2984_s3 = inlined_call_operand.vmem [shape: f32[1,32], index: 3, kind: input, shape index: {}]   ;;  %s2985_s4 = inlined_call_operand.vmem [shape: bf16[2,32,96], index: 4, kind: input, shape index: {}]   ;;  %s2986_s5 = inlined_call_operand.vmem [shape: f32[2,1,96], index: 5, kind: input, shape index: {}]   ;;  %s2987_s6 = inlined_call_operand.vmem [shape: bf16[2,32,32], index: 6, kind: input, shape index: {}]   ;;  %s2988_s7 = inlined_call_operand.vmem [shape: f32[2,1,32], index: 7, kind: input, shape index: {}]   ;;  %s2989_s8 = inlined_call_operand.vmem [shape: f32[2,1,32], index: 8, kind: input, shape index: {}]   ;;  %s2990_s9 = inlined_call_operand.vmem [shape: f32[2,1,32], index: 9, kind: input, shape index: {}]   ;;  %s2991_s10 = inlined_call_operand.vmem [shape: bf16[2,32,64], index: 10, kind: input, shape index: {}]   ;;  %s2992_s11 = inlined_call_operand.vmem [shape: f32[2,1,64], index: 11, kind: input, shape index: {}]   ;;  %s2993_s12 = inlined_call_operand.vmem [shape: bf16[2,64,32], index: 12, kind: input, shape index: {}]   ;;  %s2994_s13 = inlined_call_operand.vmem [shape: f32[2,1,32], index: 13, kind: input, shape index: {}]   ;;  %s2995_s14 = inlined_call_operand.vmem [shape: f32[2,1,32], index: 14, kind: input, shape index: {}]   ;;  %s2996_s15 = inlined_call_operand.vmem [shape: f32[2,1,32], index: 15, kind: input, shape index: {}]   ;;  %s2997_s16 = inlined_call_operand.vmem [shape: bf16[32,32], index: 16, kind: input, shape index: {}]   ;;  %s2998_s17 = inlined_call_operand.vmem [shape: f32[1,32], index: 17, kind: input, shape index: {}]   ;;  %s2999_s18 = inlined_call_operand.vmem [shape: bf16[32,128], index: 18, kind: input, shape index: {}]   ;;  %s3000_s19 = inlined_call_operand.vmem [shape: f32[1,128], index: 19, kind: input, shape index: {}]   ;;  %s3001_s20 = inlined_call_operand.hbm [shape: f32[2,128], index: 20, kind: output, shape index: {}]  }
   0x1   :  { %3004 = sst [smem:[#allocation5_spill]] %s2981_s0 }
   0x2   :  { %3005 = sst [smem:[#allocation6_spill]] %s2982_s1 }
   0x3   :  { %3006 = sst [smem:[#allocation7_spill]] %s2983_s2 }
   0x4   :  { %3007 = sst [smem:[#allocation8_spill]] %s2984_s3 }
   0x5   :  { %3008 = sst [smem:[#allocation9_spill]] %s2985_s4 }
   0x6   :  { %s3009_s23 = sld [smem:[#allocation5_spill]]  ;;  %vm71_vm0 = vcmask 261120  }
   0xc   :  { %v67_v0 = vld [vmem:[%s3009_s23] sm:$0xff]  ;;  %v68_v1 = vld [vmem:[%s3009_s23 + $0x8] sm:$0xff] }
   0xd   :  { %v72_v2 = vsel %vm71_vm0, %v67_v0, 0.0  ;;  %v75_v3 = vsel %vm71_vm0, %v68_v1, 0.0 }
   0xe   :  { %73 = vadd.xlane.f32.xlu0 %v72_v2 }
  0x12   :  { %76 = vadd.xlane.f32.xlu0 %v75_v3 }
  0x13   :  { %25 = vsyncpa [#allocation3], 0  ;;  %s3010_s26 = sld [smem:[#allocation9_spill]]  ;;  %v2467_v15 = vmov 0.0   ;;  %vm2468_vm1 = vmmov 0   ;;  %s2469_s24 = smov 80   ;;  %v236_v53 = vlaneseq }
  0x14   :  { %2156 = vmatprep.subr.bf16.mxu0 %v2467_v15  ;;  %2160 = vmatprep.mubr.msk.bf16.mxu0 %vm2468_vm1, %v2467_v15  ;;  %s3011_s30 = sld [smem:[#allocation7_spill]]  ;;  %v1994_v34 = vld [vmem:[%s2986_s5] ss:$0 sm:$0xff]  ;;  %s2470_s2 = smov 96   ;;  %vm188_vm2 = vcmask 130048   ;;  %vm241_vm3 = vcmask 64512  }
  0x15   :  { %2164 = vmatprep.subr.bf16.mxu1 %v2467_v15  ;;  %2166 = vmatprep.mubr.msk.bf16.mxu1 %vm2468_vm1, %v2467_v15  ;;  %s3012_s1 = sld [smem:[#allocation8_spill]]  ;;  %s2471_s25 = smov 112   ;;  %v237_v54 = vshrl.u32 %v236_v53, 7  ;;  %vm259_vm4 = vcmask 1043456   ;;  %vm886_vm5 = vcmask 523264   ;;  %vm1840_vm6 = vcmask 1040384  }
  0x16   :  { %s3013_s28 = sld [smem:[#allocation6_spill]]  ;;  %s2472_s4 = smov 48  }
  0x17   :  { %v238_v55 = vsub.s32 0, %v237_v54  ;;  %s2473_s29 = smov 64   ;;  %s2474_s22 = smov 16  }
  0x19   :  { %v2359_v14 = vld [vmem:[%s3010_s26 + $0x8] sm:$0xff]   ;;  %v2360_v16 = vld [vmem:[%s3010_s26] sm:$0xff]  }
  0x1a   :  { %2157 = vmatpush3.bf16.msra.mxu0 %v2359_v14  ;;  %v1992_v25 = vld [vmem:[%s3011_s30] ss:$0 sm:$0xff] }
  0x1b   :  { %2158 = vmatprep.subr.bf16.mxu0 %v2467_v15  ;;  %v1993_v29 = vld [vmem:[%s3012_s1] ss:$0 sm:$0xff] }
  0x1c   :  { %v115_v56 = vld [vmem:[%s3013_s28] sm:$0x3] }
  0x1d   :  { %v2664_v57 = vrot.slane %v115_v56, %v238_v55 }
  0x1e   :  { %2159 = vmatpush3.bf16.msra.mxu0 %v2360_v16 }
  0x1f   :  { %2170 = vmatprep.subr.bf16.mxu0 %v2467_v15 }
  0x97   :  { %v74_v4 = vpop.xlane.xlu0 %73 }
  0x98   :  { %v79_v5 = vmul.f32 0.03125, %v74_v4 }
  0x9a   :  { %v81_v6 = vsub.f32 %v67_v0, %v79_v5  ;;  %v473_v5 = vsub.s32 1, %v237_v54 }
  0x9b   :  { %v77_v7 = vpop.xlane.xlu0 %76 }
  0x9c   :  { %v80_v8 = vmul.f32 0.03125, %v77_v7  ;;  %v83_v9 = vmul.f32 %v81_v6, %v81_v6 }
  0x9e   :  { %v82_v10 = vsub.f32 %v68_v1, %v80_v8  ;;  %v85_v11 = vsel %vm71_vm0, %v83_v9, 0.0  ;;  %v2670_v9 = vrot.slane %v115_v56, %v473_v5 }
  0x9f   :  { %86 = vadd.xlane.f32.xlu1 %v85_v11 }
  0xa0   :  { %v84_v12 = vmul.f32 %v82_v10, %v82_v10 }
  0xa2   :  { %v88_v13 = vsel %vm71_vm0, %v84_v12, 0.0 }
  0xa3   :  { %89 = vadd.xlane.f32.xlu1 %v88_v13 }
 0x128   :  { %v87_v17 = vpop.xlane.xlu1 %86 }
 0x129   :  { %v91_v18 = vmul.f32 0.03125, %v87_v17 }
 0x12b   :  { %v93_v19 = vadd.f32 1e-12, %v91_v18 }
 0x12c   :  { %v90_v20 = vpop.xlane.xlu1 %89 }
 0x12d   :  { %2383 = vrsqrt.f32 %v93_v19  ;;  %v92_v21 = vmul.f32 0.03125, %v90_v20 }
 0x12f   :  { %v94_v22 = vadd.f32 1e-12, %v92_v21 }
 0x131   :  { %2385 = vrsqrt.f32 %v94_v22 }
 0x13a   :  { %v2384_v23 = vpop.eup %2383 }
 0x13b   :  { %v97_v24 = vmul.f32 %v2384_v23, %v81_v6 }
 0x13d   :  { %v105_v28 = vmul.f32 %v1992_v25, %v97_v24 }
 0x13e   :  { %v2386_v26 = vpop.eup %2385 }
 0x13f   :  { %v98_v27 = vmul.f32 %v2386_v26, %v82_v10  ;;  %v2611_v31 = vadd.f32 %v1993_v29, %v105_v28 }
 0x141   :  { %v106_v30 = vmul.f32 %v1992_v25, %v98_v27 }
 0x143   :  { %v2613_v32 = vadd.f32 %v1993_v29, %v106_v30 }
 0x145   :  { %v121_v33 = vpack.c.bf16 %v2613_v32, %v2611_v31 }
 0x147   :  { %2161 = vmatmul.mubr.msk.bf16.vlgmr.msra.gmra.mxu0 %vm71_vm0, %v121_v33 }
 0x148   :  { %2172 = vmatprep.mubr.msk.bf16.mxu0 %vm2468_vm1, %v2467_v15 }
 0x207   :  { %v177_v35 = vpop.f32.mrf.mxu0 }
 0x208   :  { %v178_v36 = vadd.f32 %v1994_v34, %v177_v35 }
 0x209   :  { %v2162_v37 = vpop.f32.mrf.mxu0 }
 0x20a   :  { %v2623_v38 = vpack.c.bf16 %v178_v36, %v178_v36 }
 0x20b   :  { %v180_v39 = vpop.f32.mrf.mxu0 }
 0x20c   :  { %v181_v40 = vadd.f32 %v1994_v34, %v180_v39  ;;  %305 = vrot.lane.b32.xlu1 %v2623_v38, %s2469_s24  ;;  %186 = vrot.lane.b32.xlu0 %v2623_v38, %s2470_s2 }
 0x20d   :  { %v2163_v41 = vpop.f32.mrf.mxu0 }
 0x20e   :  { %v2629_v42 = vpack.c.bf16 %v181_v40, %v181_v40 }
 0x210   :  { %303 = vrot.lane.b32.xlu1 %v2623_v38, %s2471_s25  ;;  %538 = vrot.lane.b32.xlu0 %v2629_v42, %s2469_s24 }
 0x214   :  { %422 = vrot.lane.b32.xlu1 %v2629_v42, %s2470_s2 }
 0x218   :  { %536 = vrot.lane.b32.xlu1 %v2629_v42, %s2471_s25 }
 0x27e   :  { %v187_v43 = vpop.permute.xlu0 %186  ;;  %v306_v45 = vpop.permute.xlu1 %305 }
 0x27f   :  { %v193_v44 = vsel %vm188_vm2, %v187_v43, 0  ;;  %v311_v47 = vsel %vm188_vm2, %v306_v45, 0 }
 0x280   :  { %2165 = vmatpush3.bf16.xpose.msra.mxu1 %v193_v44 }
 0x281   :  { %2176 = vmatprep.subr.bf16.mxu1 %v2467_v15 }
 0x282   :  { %v304_v46 = vpop.permute.xlu1 %303  ;;  %v539_v50 = vpop.permute.xlu0 %538 }
 0x283   :  { %v544_v51 = vsel %vm188_vm2, %v539_v50, 0 }
 0x286   :  { %v423_v48 = vpop.permute.xlu1 %422 }
 0x287   :  { %2167 = vmatmul.mubr.msk.bf16.vlgmr.msra.gmra.mxu1 %vm188_vm2, %v2623_v38  ;;  %v428_v49 = vsel %vm188_vm2, %v423_v48, 0 }
 0x288   :  { %2177 = vmatpush3.bf16.xpose.msra.mxu1 %v311_v47  ;;  %2178 = vmatprep.mubr.msk.bf16.mxu1 %vm2468_vm1, %v2467_v15 }
 0x289   :  { %2188 = vmatprep.subr.bf16.mxu1 %v2467_v15 }
 0x28a   :  { %v537_v52 = vpop.permute.xlu1 %536 }
 0x28f   :  { %2179 = vmatmul.mubr.msk.bf16.vlgmr.msra.gmra.mxu1 %vm188_vm2, %v304_v46 }
 0x290   :  { %2189 = vmatpush3.bf16.xpose.msra.mxu1 %v428_v49  ;;  %2190 = vmatprep.mubr.msk.bf16.mxu1 %vm2468_vm1, %v2467_v15 }
 0x291   :  { %2200 = vmatprep.subr.bf16.mxu1 %v2467_v15 }
 0x297   :  { %2191 = vmatmul.mubr.msk.bf16.vlgmr.msra.gmra.mxu1 %vm188_vm2, %v2629_v42 }
 0x298   :  { %2201 = vmatpush3.bf16.xpose.msra.mxu1 %v544_v51  ;;  %2202 = vmatprep.mubr.msk.bf16.mxu1 %vm2468_vm1, %v2467_v15 }
 0x299   :  { %2212 = vmatprep.subr.bf16.mxu1 %v2467_v15 }
 0x29f   :  { %2203 = vmatmul.mubr.msk.bf16.vlgmr.msra.gmra.mxu1 %vm188_vm2, %v537_v52 }
 0x2a0   :  { %2216 = vmatprep.mubr.msk.bf16.mxu1 %vm2468_vm1, %v2467_v15 }
 0x347   :  { %v229_v58 = vpop.f32.mrf.mxu1 }
 0x348   :  { %v235_v59 = vmul.f32 0.25, %v229_v58 }
 0x349   :  { %v2168_v60 = vpop.f32.mrf.mxu1 }
 0x34a   :  { %v240_v61 = vadd.f32 %v2664_v57, %v235_v59 }
 0x34b   :  { %v232_v62 = vpop.f32.mrf.mxu1 }
 0x34c   :  { %v242_v63 = vsel %vm241_vm3, %v240_v61, -inf }
 0x34d   :  { %v2169_v0 = vpop.f32.mrf.mxu1  ;;  %243 = vmax.xlane.f32.xlu0 %v242_v63 }
 0x34f   :  { %v347_v1 = vpop.f32.mrf.mxu1 }
 0x350   :  { %v353_v2 = vmul.f32 0.25, %v347_v1 }
 0x351   :  { %v2180_v3 = vpop.f32.mrf.mxu1 }
 0x352   :  { %v354_v4 = vadd.f32 %v353_v2, %v2664_v57 }
 0x353   :  { %v350_v6 = vpop.f32.mrf.mxu1 }
 0x354   :  { %v355_v7 = vsel %vm241_vm3, %v354_v4, -inf }
 0x355   :  { %v2181_v8 = vpop.f32.mrf.mxu1  ;;  %356 = vmax.xlane.f32.xlu1 %v355_v7 }
 0x356   :  { %v2361_v8 = vld [vmem:[%s2987_s6 + $0x8] sm:$0xff]  }
 0x357   :  { %v464_v10 = vpop.f32.mrf.mxu1  ;;  %2213 = vmatpush3.bf16.msra.mxu1 %v2361_v8 }
 0x358   :  { %v470_v11 = vmul.f32 0.25, %v464_v10  ;;  %2214 = vmatprep.subr.bf16.mxu1 %v2467_v15 }
 0x359   :  { %v2192_v12 = vpop.f32.mrf.mxu1 }
 0x35a   :  { %v475_v13 = vadd.f32 %v2670_v9, %v470_v11 }
 0x35b   :  { %v467_v14 = vpop.f32.mrf.mxu1 }
 0x35c   :  { %v476_v16 = vsel %vm241_vm3, %v475_v13, -inf }
 0x35d   :  { %477 = vmax.xlane.f32.xlu0 %v476_v16  ;;  %v2193_v17 = vpop.f32.mrf.mxu1 }
 0x35f   :  { %v580_v18 = vpop.f32.mrf.mxu1 }
 0x360   :  { %v586_v19 = vmul.f32 0.25, %v580_v18 }
 0x361   :  { %v2204_v20 = vpop.f32.mrf.mxu1 }
 0x362   :  { %v587_v21 = vadd.f32 %v586_v19, %v2670_v9 }
 0x363   :  { %v583_v22 = vpop.f32.mrf.mxu1 }
 0x364   :  { %v588_v23 = vsel %vm241_vm3, %v587_v21, -inf }
 0x365   :  { %589 = vmax.xlane.f32.xlu0 %v588_v23  ;;  %v2205_v24 = vpop.f32.mrf.mxu1  ;;  %v2362_v23 = vld [vmem:[%s2987_s6] sm:$0xff]  }
 0x366   :  { %2215 = vmatpush3.bf16.msra.mxu1 %v2362_v23 }
 0x367   :  { %2228 = vmatprep.subr.bf16.mxu1 %v2467_v15 }
 0x3d6   :  { %v244_v25 = vpop.xlane.xlu0 %243 }
 0x3d7   :  { %v245_v26 = vsub.f32 %v240_v61, %v244_v25 }
 0x3d9   :  { %v246_v27 = vmul.f32 1.442695, %v245_v26 }
 0x3db   :  { %2387 = vpow2.f32 %v246_v27 }
 0x3de   :  { %v357_v28 = vpop.xlane.xlu1 %356 }
 0x3df   :  { %v358_v29 = vsub.f32 %v354_v4, %v357_v28 }
 0x3e1   :  { %v359_v30 = vmul.f32 1.442695, %v358_v29 }
 0x3e3   :  { %2389 = vpow2.f32 %v359_v30 }
 0x3e6   :  { %v478_v33 = vpop.xlane.xlu0 %477 }
 0x3e7   :  { %v479_v34 = vsub.f32 %v475_v13, %v478_v33 }
 0x3e8   :  { %v2388_v35 = vpop.eup %2387 }
 0x3e9   :  { %v480_v36 = vmul.f32 1.442695, %v479_v34  ;;  %v248_v37 = vsel %vm241_vm3, %v2388_v35, 0.0 }
 0x3ea   :  { %249 = vadd.xlane.f32.xlu0 %v248_v37  ;;  %v2006_v37 = vld [vmem:[%s2988_s7] ss:$0 sm:$0xff] }
 0x3eb   :  { %2391 = vpow2.f32 %v480_v36 }
 0x3ee   :  { %v590_v44 = vpop.xlane.xlu0 %589 }
 0x3ef   :  { %v591_v45 = vsub.f32 %v587_v21, %v590_v44 }
 0x3f0   :  { %v2390_v39 = vpop.eup %2389 }
 0x3f1   :  { %v361_v40 = vsel %vm241_vm3, %v2390_v39, 0.0  ;;  %v592_v46 = vmul.f32 1.442695, %v591_v45 }
 0x3f2   :  { %362 = vadd.xlane.f32.xlu1 %v361_v40 }
 0x3f3   :  { %2393 = vpow2.f32 %v592_v46 }
 0x3f8   :  { %v2392_v41 = vpop.eup %2391 }
 0x3f9   :  { %v482_v43 = vsel %vm241_vm3, %v2392_v41, 0.0 }
 0x3fa   :  { %483 = vadd.xlane.f32.xlu0 %v482_v43 }
 0x400   :  { %v2394_v47 = vpop.eup %2393 }
 0x401   :  { %v594_v48 = vsel %vm241_vm3, %v2394_v47, 0.0 }
 0x403   :  { %367 = vrot.lane.b32.xlu1 %v2623_v38, %s2472_s4 }
 0x407   :  { %488 = vrot.lane.b32.xlu1 %v2629_v42, %s2473_s29 }
 0x410   :  { %254 = vrot.lane.b32.xlu0 %v2623_v38, %s2473_s29 }
 0x42b   :  { %595 = vadd.xlane.f32.xlu1 %v594_v48 }
 0x43c   :  { %600 = vrot.lane.b32.xlu1 %v2629_v42, %s2472_s4 }
 0x473   :  { %v250_v49 = vpop.xlane.xlu0 %249 }
 0x474   :  { %2395 = vrcp.f32 %v250_v49 }
 0x47b   :  { %v363_v50 = vpop.xlane.xlu1 %362 }
 0x47c   :  { %2397 = vrcp.f32 %v363_v50 }
 0x47f   :  { %v368_v55 = vpop.permute.xlu1 %367 }
 0x480   :  { %v373_v42 = vsel %vm259_vm4, %v368_v55, 0 }
 0x481   :  { %v2396_v51 = vpop.eup %2395 }
 0x482   :  { %v252_v53 = vmul.f32 %v2396_v51, %v2388_v35 }
 0x483   :  { %v484_v52 = vpop.xlane.xlu0 %483  ;;  %v489_v60 = vpop.permute.xlu1 %488 }
 0x484   :  { %2399 = vrcp.f32 %v484_v52  ;;  %v253_v56 = vpack.c.bf16 %v252_v53, %v252_v53  ;;  %v494_v63 = vsel %vm259_vm4, %v489_v60, 0 }
 0x487   :  { %v255_v38 = vpop.permute.xlu0 %254 }
 0x488   :  { %v261_v54 = vsel %vm259_vm4, %v255_v38, 0 }
 0x489   :  { %2171 = vmatpush3.bf16.msra.mxu0 %v261_v54  ;;  %v2398_v58 = vpop.eup %2397 }
 0x48a   :  { %2182 = vmatprep.subr.bf16.mxu0 %v2467_v15  ;;  %v365_v59 = vmul.f32 %v2398_v58, %v2390_v39 }
 0x48c   :  { %2173 = vmatmul.mubr.msk.bf16.vlgmr.msra.gmra.mxu0 %vm241_vm3, %v253_v56  ;;  %v366_v61 = vpack.c.bf16 %v365_v59, %v365_v59 }
 0x48d   :  { %2183 = vmatpush3.bf16.msra.mxu0 %v373_v42  ;;  %2184 = vmatprep.mubr.msk.bf16.mxu0 %vm2468_vm1, %v2467_v15  ;;  %v2364_v42 = vld [vmem:[%s2991_s10] sm:$0xff]  }
 0x48e   :  { %2194 = vmatprep.subr.bf16.mxu0 %v2467_v15 }
 0x491   :  { %v2400_v62 = vpop.eup %2399 }
 0x492   :  { %v486_v0 = vmul.f32 %v2400_v62, %v2392_v41 }
 0x494   :  { %2185 = vmatmul.mubr.msk.bf16.vlgmr.msra.gmra.mxu0 %vm241_vm3, %v366_v61  ;;  %v487_v1 = vpack.c.bf16 %v486_v0, %v486_v0 }
 0x495   :  { %2195 = vmatpush3.bf16.msra.mxu0 %v494_v63  ;;  %2196 = vmatprep.mubr.msk.bf16.mxu0 %vm2468_vm1, %v2467_v15 }
 0x496   :  { %2206 = vmatprep.subr.bf16.mxu0 %v2467_v15 }
 0x49c   :  { %2197 = vmatmul.mubr.msk.bf16.vlgmr.msra.gmra.mxu0 %vm241_vm3, %v487_v1 }
 0x49d   :  { %2208 = vmatprep.mubr.msk.bf16.mxu0 %vm2468_vm1, %v2467_v15 }
 0x4b4   :  { %v596_v2 = vpop.xlane.xlu1 %595 }
 0x4b5   :  { %2401 = vrcp.f32 %v596_v2 }
 0x4b8   :  { %v601_v3 = vpop.permute.xlu1 %600 }
 0x4b9   :  { %v606_v4 = vsel %vm259_vm4, %v601_v3, 0  ;;  %v2010_v3 = vld [vmem:[%s2989_s8] ss:$0 sm:$0xff] }
 0x4ba   :  { %2207 = vmatpush3.bf16.msra.mxu0 %v606_v4 }
 0x4bb   :  { %2220 = vmatprep.subr.bf16.mxu0 %v2467_v15 }
 0x4c2   :  { %v2402_v5 = vpop.eup %2401 }
 0x4c3   :  { %v598_v6 = vmul.f32 %v2402_v5, %v2394_v47 }
 0x4c5   :  { %v599_v7 = vpack.c.bf16 %v598_v6, %v598_v6 }
 0x4c7   :  { %2209 = vmatmul.mubr.msk.bf16.vlgmr.msra.gmra.mxu0 %vm241_vm3, %v599_v7  ;;  %v2011_v7 = vld [vmem:[%s2990_s9] ss:$0 sm:$0xff] }
 0x4c8   :  { %2224 = vmatprep.mubr.msk.bf16.mxu0 %vm2468_vm1, %v2467_v15 }
 0x54c   :  { %v297_v10 = vpop.f32.mrf.mxu0 }
 0x54e   :  { %v2174_v11 = vpop.f32.mrf.mxu0 }
 0x550   :  { %v300_v12 = vpop.f32.mrf.mxu0 }
 0x552   :  { %v2175_v13 = vpop.f32.mrf.mxu0 }
 0x553   :  { %v2365_v13 = vld [vmem:[%s2993_s12 + $0x18] sm:$0xff]  }
 0x554   :  { %v409_v14 = vpop.f32.mrf.mxu0 }
 0x556   :  { %v2186_v16 = vpop.f32.mrf.mxu0 }
 0x557   :  { %v2367_v16 = vld [vmem:[%s2993_s12 + $0x8] sm:$0xff]  }
 0x558   :  { %v412_v17 = vpop.f32.mrf.mxu0 }
 0x559   :  { %v2368_v17 = vld [vmem:[%s2993_s12] sm:$0xff]  }
 0x55a   :  { %v2187_v18 = vpop.f32.mrf.mxu0 }
 0x55b   :  { %v2012_v18 = vld [vmem:[%s2992_s11] ss:$0 sm:$0xff] }
 0x55c   :  { %v530_v19 = vpop.f32.mrf.mxu0 }
 0x55e   :  { %v2198_v20 = vpop.f32.mrf.mxu0 }
 0x560   :  { %v533_v21 = vpop.f32.mrf.mxu0 }
 0x562   :  { %v2199_v22 = vpop.f32.mrf.mxu0 }
 0x587   :  { %v642_v24 = vpop.f32.mrf.mxu0 }
 0x588   :  { %v2349_v25 = vpack.i.bf16 %v642_v24, %v409_v14  ;;  %v2366_v14 = vld [vmem:[%s2993_s12 + $0x10] sm:$0xff]  }
 0x589   :  { %v2210_v26 = vpop.f32.mrf.mxu0 }
 0x58a   :  { %2350 = vrot.lane.b32.xlu0 %v2349_v25, %s2474_s22 }
 0x58b   :  { %v645_v27 = vpop.f32.mrf.mxu0 }
 0x58d   :  { %v2211_v28 = vpop.f32.mrf.mxu0 }
 0x5fc   :  { %v2351_v29 = vpop.permute.xlu0 %2350 }
 0x5fd   :  { %v2353_v30 = vunpack.i.h.bf16 %v2351_v29  ;;  %v2352_v33 = vunpack.i.l.bf16 %v2351_v29 }
 0x5ff   :  { %v652_v34 = vsel %vm188_vm2, %v530_v19, %v2353_v30  ;;  %v419_v35 = vsel %vm188_vm2, %v297_v10, %v2352_v33 }
 0x600   :  { %v658_v36 = vpack.c.bf16 %v652_v34, %v419_v35 }
 0x602   :  { %2217 = vmatmul.mubr.msk.bf16.vlgmr.msra.gmra.mxu1 %vm71_vm0, %v658_v36 }
 0x603   :  { %2236 = vmatprep.mubr.msk.bf16.mxu1 %vm2468_vm1, %v2467_v15  ;;  %2229 = vmatpush3.bf16.msra.mxu1 %v2365_v13 }
 0x604   :  { %2230 = vmatprep.subr.bf16.mxu1 %v2467_v15 }
 0x607   :  { %2231 = vmatpush3.bf16.msra.mxu1 %v2366_v14  ;;  %v2029_v14 = vld [vmem:[%s2986_s5 + $0x1] ss:$0 sm:$0xff] }
 0x608   :  { %2232 = vmatprep.subr.bf16.mxu1 %v2467_v15 }
 0x60b   :  { %2233 = vmatpush3.bf16.msra.mxu1 %v2367_v16 }
 0x60c   :  { %2234 = vmatprep.subr.bf16.mxu1 %v2467_v15 }
 0x60f   :  { %2235 = vmatpush3.bf16.msra.mxu1 %v2368_v17 }
 0x610   :  { %2254 = vmatprep.subr.bf16.mxu1 %v2467_v15 }
 0x6c2   :  { %v714_v39 = vpop.f32.mrf.mxu1 }
 0x6c3   :  { %v715_v40 = vadd.f32 %v2006_v37, %v714_v39  ;;  %v2016_v39 = vld [vmem:[%s2994_s13] ss:$0 sm:$0xff] }
 0x6c4   :  { %v2218_v41 = vpop.f32.mrf.mxu1 }
 0x6c5   :  { %v721_v43 = vadd.f32 %v715_v40, %v2611_v31 }
 0x6c6   :  { %v717_v44 = vpop.f32.mrf.mxu1 }
 0x6c7   :  { %v718_v45 = vadd.f32 %v2006_v37, %v717_v44  ;;  %v725_v46 = vsel %vm71_vm0, %v721_v43, 0.0 }
 0x6c8   :  { %726 = vadd.xlane.f32.xlu1 %v725_v46  ;;  %v2219_v47 = vpop.f32.mrf.mxu1 }
 0x6c9   :  { %v722_v48 = vadd.f32 %v718_v45, %v2613_v32  ;;  %v2363_v32 = vld [vmem:[%s2991_s10 + $0x8] sm:$0xff]  }
 0x6ca   :  { %2221 = vmatpush3.bf16.msra.mxu0 %v2363_v32 }
 0x6cb   :  { %v728_v49 = vsel %vm71_vm0, %v722_v48, 0.0  ;;  %2222 = vmatprep.subr.bf16.mxu0 %v2467_v15 }
 0x6cc   :  { %729 = vadd.xlane.f32.xlu0 %v728_v49 }
 0x6ce   :  { %2223 = vmatpush3.bf16.msra.mxu0 %v2364_v42  ;;  %v2369_v42 = vld [vmem:[%s3010_s26 + $0x18] sm:$0xff]  }
 0x6cf   :  { %2240 = vmatprep.subr.bf16.mxu0 %v2467_v15 }
 0x751   :  { %v727_v50 = vpop.xlane.xlu1 %726 }
 0x752   :  { %v731_v51 = vmul.f32 0.03125, %v727_v50 }
 0x754   :  { %v733_v52 = vsub.f32 %v721_v43, %v731_v51 }
 0x755   :  { %v730_v53 = vpop.xlane.xlu0 %729 }
 0x756   :  { %v732_v38 = vmul.f32 0.03125, %v730_v53  ;;  %v735_v54 = vmul.f32 %v733_v52, %v733_v52 }
 0x758   :  { %v734_v55 = vsub.f32 %v722_v48, %v732_v38  ;;  %v737_v31 = vsel %vm71_vm0, %v735_v54, 0.0 }
 0x759   :  { %738 = vadd.xlane.f32.xlu0 %v737_v31 }
 0x75a   :  { %v736_v56 = vmul.f32 %v734_v55, %v734_v55 }
 0x75c   :  { %v740_v58 = vsel %vm71_vm0, %v736_v56, 0.0 }
 0x75d   :  { %741 = vadd.xlane.f32.xlu0 %v740_v58 }
 0x7e2   :  { %v739_v59 = vpop.xlane.xlu0 %738 }
 0x7e3   :  { %v743_v60 = vmul.f32 0.03125, %v739_v59  ;;  %v2370_v59 = vld [vmem:[%s3010_s26 + $0x10] sm:$0xff]  }
 0x7e5   :  { %v745_v61 = vadd.f32 1e-12, %v743_v60 }
 0x7e6   :  { %v742_v62 = vpop.xlane.xlu0 %741 }
 0x7e7   :  { %2403 = vrsqrt.f32 %v745_v61  ;;  %v744_v63 = vmul.f32 0.03125, %v742_v62 }
 0x7e9   :  { %v746_v0 = vadd.f32 1e-12, %v744_v63 }
 0x7eb   :  { %2405 = vrsqrt.f32 %v746_v0 }
 0x7f4   :  { %v2404_v1 = vpop.eup %2403 }
 0x7f5   :  { %v749_v2 = vmul.f32 %v2404_v1, %v733_v52 }
 0x7f7   :  { %v757_v6 = vmul.f32 %v2010_v3, %v749_v2 }
 0x7f8   :  { %v2406_v4 = vpop.eup %2405 }
 0x7f9   :  { %v750_v5 = vmul.f32 %v2406_v4, %v734_v55  ;;  %v765_v10 = vadd.f32 %v2011_v7, %v757_v6  ;;  %v2022_v4 = vld [vmem:[%s2995_s14] ss:$0 sm:$0xff] }
 0x7fb   :  { %v758_v8 = vmul.f32 %v2010_v3, %v750_v5 }
 0x7fd   :  { %v766_v11 = vadd.f32 %v2011_v7, %v758_v8  ;;  %v2023_v8 = vld [vmem:[%s2996_s15] ss:$0 sm:$0xff] }
 0x7ff   :  { %v772_v12 = vpack.c.bf16 %v766_v11, %v765_v10 }
 0x801   :  { %2225 = vmatmul.mubr.msk.bf16.vlgmr.msra.gmra.mxu0 %vm71_vm0, %v772_v12 }
 0x802   :  { %2244 = vmatprep.mubr.msk.bf16.mxu0 %vm2468_vm1, %v2467_v15  ;;  %2241 = vmatpush3.bf16.msra.mxu0 %v2369_v42 }
 0x803   :  { %2242 = vmatprep.subr.bf16.mxu0 %v2467_v15 }
 0x806   :  { %2243 = vmatpush3.bf16.msra.mxu0 %v2370_v59 }
 0x807   :  { %2248 = vmatprep.subr.bf16.mxu0 %v2467_v15 }
 0x8c1   :  { %v828_v19 = vpop.f32.mrf.mxu0 }
 0x8c2   :  { %v829_v20 = vadd.f32 %v2012_v18, %v828_v19 }
 0x8c3   :  { %v2226_v21 = vpop.f32.mrf.mxu0 }
 0x8c4   :  { %v838_v22 = vmul.f32 0.70710677, %v829_v20  ;;  %v835_v30 = vmul.f32 0.5, %v829_v20 }
 0x8c5   :  { %v831_v23 = vpop.f32.mrf.mxu0 }
 0x8c6   :  { %2407 = verf.f32 %v838_v22  ;;  %v832_v24 = vadd.f32 %v2012_v18, %v831_v23 }
 0x8c7   :  { %v2227_v25 = vpop.f32.mrf.mxu0 }
 0x8c8   :  { %v839_v26 = vmul.f32 0.70710677, %v832_v24  ;;  %v836_v33 = vmul.f32 0.5, %v832_v24 }
 0x8ca   :  { %2409 = verf.f32 %v839_v26 }
 0x8d3   :  { %v2408_v27 = vpop.eup %2407 }
 0x8d4   :  { %v842_v28 = vadd.f32 1.0, %v2408_v27 }
 0x8d6   :  { %v844_v35 = vmul.f32 %v842_v28, %v835_v30 }
 0x8d7   :  { %v2410_v29 = vpop.eup %2409 }
 0x8d8   :  { %v843_v34 = vadd.f32 1.0, %v2410_v29 }
 0x8da   :  { %v845_v36 = vmul.f32 %v843_v34, %v836_v33 }
 0x8dc   :  { %v855_v37 = vpack.c.bf16 %v845_v36, %v844_v35 }
 0x8de   :  { %2237 = vmatmul.mubr.msk.bf16.vlgmr.msra.gmra.mxu1 %vm886_vm5, %v855_v37 }
 0x8df   :  { %2256 = vmatprep.mubr.msk.bf16.mxu1 %vm2468_vm1, %v2467_v15 }
 0x99e   :  { %v924_v40 = vpop.f32.mrf.mxu1 }
 0x99f   :  { %v925_v41 = vadd.f32 %v2016_v39, %v924_v40 }
 0x9a0   :  { %v2238_v43 = vpop.f32.mrf.mxu1 }
 0x9a1   :  { %v931_v44 = vadd.f32 %v925_v41, %v765_v10 }
 0x9a2   :  { %v927_v45 = vpop.f32.mrf.mxu1 }
 0x9a3   :  { %v928_v46 = vadd.f32 %v2016_v39, %v927_v45  ;;  %v935_v47 = vsel %vm71_vm0, %v931_v44, 0.0 }
 0x9a4   :  { %936 = vadd.xlane.f32.xlu1 %v935_v47  ;;  %v2239_v48 = vpop.f32.mrf.mxu1 }
 0x9a5   :  { %v932_v49 = vadd.f32 %v928_v46, %v766_v11 }
 0x9a7   :  { %v938_v50 = vsel %vm71_vm0, %v932_v49, 0.0 }
 0x9a8   :  { %939 = vadd.xlane.f32.xlu0 %v938_v50 }
 0xa2d   :  { %v937_v51 = vpop.xlane.xlu1 %936 }
 0xa2e   :  { %v941_v52 = vmul.f32 0.03125, %v937_v51 }
 0xa30   :  { %v943_v53 = vsub.f32 %v931_v44, %v941_v52 }
 0xa31   :  { %v940_v38 = vpop.xlane.xlu0 %939 }
 0xa32   :  { %v942_v54 = vmul.f32 0.03125, %v940_v38  ;;  %v945_v55 = vmul.f32 %v943_v53, %v943_v53 }
 0xa34   :  { %v944_v31 = vsub.f32 %v932_v49, %v942_v54  ;;  %v947_v56 = vsel %vm71_vm0, %v945_v55, 0.0 }
 0xa35   :  { %948 = vadd.xlane.f32.xlu1 %v947_v56 }
 0xa36   :  { %v946_v58 = vmul.f32 %v944_v31, %v944_v31 }
 0xa38   :  { %v950_v32 = vsel %vm71_vm0, %v946_v58, 0.0 }
 0xa39   :  { %951 = vadd.xlane.f32.xlu0 %v950_v32 }
 0xabe   :  { %v949_v60 = vpop.xlane.xlu1 %948 }
 0xabf   :  { %v953_v61 = vmul.f32 0.03125, %v949_v60 }
 0xac1   :  { %v955_v62 = vadd.f32 1e-12, %v953_v61 }
 0xac2   :  { %v952_v63 = vpop.xlane.xlu0 %951 }
 0xac3   :  { %2411 = vrsqrt.f32 %v955_v62  ;;  %v954_v0 = vmul.f32 0.03125, %v952_v63 }
 0xac5   :  { %v956_v1 = vadd.f32 1e-12, %v954_v0 }
 0xac7   :  { %2413 = vrsqrt.f32 %v956_v1 }
 0xad0   :  { %v2412_v2 = vpop.eup %2411 }
 0xad1   :  { %v959_v3 = vmul.f32 %v2412_v2, %v943_v53 }
 0xad3   :  { %v967_v7 = vmul.f32 %v2022_v4, %v959_v3 }
 0xad4   :  { %v2414_v5 = vpop.eup %2413 }
 0xad5   :  { %v960_v6 = vmul.f32 %v2414_v5, %v944_v31  ;;  %v2791_v11 = vadd.f32 %v2023_v8, %v967_v7 }
 0xad7   :  { %v968_v10 = vmul.f32 %v2022_v4, %v960_v6 }
 0xad9   :  { %v2793_v12 = vadd.f32 %v2023_v8, %v968_v10 }
 0xadb   :  { %v984_v13 = vpack.c.bf16 %v2793_v12, %v2791_v11 }
 0xadd   :  { %2245 = vmatmul.mubr.msk.bf16.vlgmr.msra.gmra.mxu0 %vm71_vm0, %v984_v13 }
 0xade   :  { %2250 = vmatprep.mubr.msk.bf16.mxu0 %vm2468_vm1, %v2467_v15 }
 0xb9d   :  { %v1040_v16 = vpop.f32.mrf.mxu0 }
 0xb9e   :  { %v1041_v17 = vadd.f32 %v2029_v14, %v1040_v16 }
 0xb9f   :  { %v2246_v18 = vpop.f32.mrf.mxu0 }
 0xba0   :  { %v2803_v19 = vpack.c.bf16 %v1041_v17, %v1041_v17 }
 0xba1   :  { %v1043_v20 = vpop.f32.mrf.mxu0 }
 0xba2   :  { %v1044_v21 = vadd.f32 %v2029_v14, %v1043_v20  ;;  %1161 = vrot.lane.b32.xlu0 %v2803_v19, %s2469_s24  ;;  %1049 = vrot.lane.b32.xlu1 %v2803_v19, %s2470_s2 }
 0xba3   :  { %v2247_v22 = vpop.f32.mrf.mxu0 }
 0xba4   :  { %v2809_v23 = vpack.c.bf16 %v1044_v21, %v1044_v21 }
 0xba6   :  { %1159 = vrot.lane.b32.xlu1 %v2803_v19, %s2471_s25  ;;  %1388 = vrot.lane.b32.xlu0 %v2809_v23, %s2471_s25 }
 0xbaa   :  { %1278 = vrot.lane.b32.xlu1 %v2809_v23, %s2470_s2 }
 0xbae   :  { %1390 = vrot.lane.b32.xlu1 %v2809_v23, %s2469_s24 }
 0xc14   :  { %v1050_v24 = vpop.permute.xlu1 %1049  ;;  %v1162_v26 = vpop.permute.xlu0 %1161 }
 0xc15   :  { %v1055_v25 = vsel %vm188_vm2, %v1050_v24, 0  ;;  %v1167_v28 = vsel %vm188_vm2, %v1162_v26, 0 }
 0xc16   :  { %2249 = vmatpush3.bf16.xpose.msra.mxu0 %v1055_v25 }
 0xc17   :  { %2260 = vmatprep.subr.bf16.mxu0 %v2467_v15 }
 0xc18   :  { %v1160_v27 = vpop.permute.xlu1 %1159  ;;  %v1389_v35 = vpop.permute.xlu0 %1388 }
 0xc1c   :  { %v1279_v29 = vpop.permute.xlu1 %1278 }
 0xc1d   :  { %2251 = vmatmul.mubr.msk.bf16.vlgmr.msra.gmra.mxu0 %vm188_vm2, %v2803_v19  ;;  %v1284_v30 = vsel %vm188_vm2, %v1279_v29, 0 }
 0xc1e   :  { %2261 = vmatpush3.bf16.xpose.msra.mxu0 %v1167_v28  ;;  %2262 = vmatprep.mubr.msk.bf16.mxu0 %vm2468_vm1, %v2467_v15 }
 0xc1f   :  { %2272 = vmatprep.subr.bf16.mxu0 %v2467_v15 }
 0xc20   :  { %v1391_v33 = vpop.permute.xlu1 %1390 }
 0xc21   :  { %v1396_v34 = vsel %vm188_vm2, %v1391_v33, 0 }
 0xc25   :  { %2263 = vmatmul.mubr.msk.bf16.vlgmr.msra.gmra.mxu0 %vm188_vm2, %v1160_v27 }
 0xc26   :  { %2273 = vmatpush3.bf16.xpose.msra.mxu0 %v1284_v30  ;;  %2274 = vmatprep.mubr.msk.bf16.mxu0 %vm2468_vm1, %v2467_v15 }
 0xc27   :  { %2284 = vmatprep.subr.bf16.mxu0 %v2467_v15 }
 0xc2d   :  { %2275 = vmatmul.mubr.msk.bf16.vlgmr.msra.gmra.mxu0 %vm188_vm2, %v2809_v23 }
 0xc2e   :  { %2285 = vmatpush3.bf16.xpose.msra.mxu0 %v1396_v34  ;;  %2286 = vmatprep.mubr.msk.bf16.mxu0 %vm2468_vm1, %v2467_v15 }
 0xc2f   :  { %2296 = vmatprep.subr.bf16.mxu0 %v2467_v15 }
 0xc35   :  { %2287 = vmatmul.mubr.msk.bf16.vlgmr.msra.gmra.mxu0 %vm188_vm2, %v1389_v35 }
 0xc36   :  { %2300 = vmatprep.mubr.msk.bf16.mxu0 %vm2468_vm1, %v2467_v15 }
 0xcdd   :  { %v1091_v36 = vpop.f32.mrf.mxu0 }
 0xcde   :  { %v1097_v37 = vmul.f32 0.25, %v1091_v36 }
 0xcdf   :  { %v2252_v39 = vpop.f32.mrf.mxu0 }
 0xce0   :  { %v1098_v40 = vadd.f32 %v1097_v37, %v2664_v57 }
 0xce1   :  { %v1094_v41 = vpop.f32.mrf.mxu0 }
 0xce2   :  { %v1099_v43 = vsel %vm241_vm3, %v1098_v40, -inf }
 0xce3   :  { %1100 = vmax.xlane.f32.xlu1 %v1099_v43  ;;  %v2253_v44 = vpop.f32.mrf.mxu0 }
 0xce5   :  { %v1203_v45 = vpop.f32.mrf.mxu0 }
 0xce6   :  { %v1209_v46 = vmul.f32 0.25, %v1203_v45 }
 0xce7   :  { %v2264_v47 = vpop.f32.mrf.mxu0 }
 0xce8   :  { %v1210_v48 = vadd.f32 %v1209_v46, %v2664_v57 }
 0xce9   :  { %v1206_v49 = vpop.f32.mrf.mxu0 }
 0xcea   :  { %v1211_v50 = vsel %vm241_vm3, %v1210_v48, -inf  ;;  %v2371_v49 = vld [vmem:[%s2987_s6 + $0x18] sm:$0xff]  }
 0xceb   :  { %1212 = vmax.xlane.f32.xlu0 %v1211_v50  ;;  %v2265_v51 = vpop.f32.mrf.mxu0  ;;  %2297 = vmatpush3.bf16.msra.mxu0 %v2371_v49 }
 0xcec   :  { %2298 = vmatprep.subr.bf16.mxu0 %v2467_v15 }
 0xced   :  { %v1320_v52 = vpop.f32.mrf.mxu0 }
 0xcee   :  { %v1326_v53 = vmul.f32 0.25, %v1320_v52 }
 0xcef   :  { %v2276_v38 = vpop.f32.mrf.mxu0 }
 0xcf0   :  { %v1327_v54 = vadd.f32 %v1326_v53, %v2670_v9 }
 0xcf1   :  { %v1323_v55 = vpop.f32.mrf.mxu0 }
 0xcf2   :  { %v1328_v31 = vsel %vm241_vm3, %v1327_v54, -inf }
 0xcf3   :  { %1329 = vmax.xlane.f32.xlu0 %v1328_v31  ;;  %v2277_v56 = vpop.f32.mrf.mxu0 }
 0xcf4   :  { %v2372_v56 = vld [vmem:[%s2987_s6 + $0x10] sm:$0xff]  }
 0xcf5   :  { %v1432_v58 = vpop.f32.mrf.mxu0  ;;  %2299 = vmatpush3.bf16.msra.mxu0 %v2372_v56 }
 0xcf6   :  { %v1438_v32 = vmul.f32 0.25, %v1432_v58  ;;  %2312 = vmatprep.subr.bf16.mxu0 %v2467_v15 }
 0xcf7   :  { %v2288_v42 = vpop.f32.mrf.mxu0 }
 0xcf8   :  { %v1439_v57 = vadd.f32 %v1438_v32, %v2670_v9 }
 0xcf9   :  { %v1435_v59 = vpop.f32.mrf.mxu0 }
 0xcfa   :  { %v1440_v60 = vsel %vm241_vm3, %v1439_v57, -inf }
 0xcfb   :  { %1441 = vmax.xlane.f32.xlu0 %v1440_v60  ;;  %v2289_v61 = vpop.f32.mrf.mxu0 }
 0xd6c   :  { %v1101_v62 = vpop.xlane.xlu1 %1100 }
 0xd6d   :  { %v1102_v63 = vsub.f32 %v1098_v40, %v1101_v62 }
 0xd6f   :  { %v1103_v0 = vmul.f32 1.442695, %v1102_v63 }
 0xd71   :  { %2415 = vpow2.f32 %v1103_v0 }
 0xd74   :  { %v1213_v1 = vpop.xlane.xlu0 %1212 }
 0xd75   :  { %v1214_v2 = vsub.f32 %v1210_v48, %v1213_v1 }
 0xd77   :  { %v1215_v3 = vmul.f32 1.442695, %v1214_v2 }
 0xd79   :  { %2417 = vpow2.f32 %v1215_v3 }
 0xd7c   :  { %v1330_v6 = vpop.xlane.xlu0 %1329 }
 0xd7d   :  { %v1331_v17 = vsub.f32 %v1327_v54, %v1330_v6  ;;  %v2046_v6 = vld [vmem:[%s2988_s7 + $0x1] ss:$0 sm:$0xff] }
 0xd7e   :  { %v2416_v4 = vpop.eup %2415 }
 0xd7f   :  { %v1105_v5 = vsel %vm241_vm3, %v2416_v4, 0.0  ;;  %v1332_v18 = vmul.f32 1.442695, %v1331_v17 }
 0xd80   :  { %1106 = vadd.xlane.f32.xlu1 %v1105_v5 }
 0xd84   :  { %v1442_v7 = vpop.xlane.xlu0 %1441 }
 0xd85   :  { %v1443_v9 = vsub.f32 %v1439_v57, %v1442_v7 }
 0xd86   :  { %v2418_v8 = vpop.eup %2417 }
 0xd87   :  { %v1444_v10 = vmul.f32 1.442695, %v1443_v9  ;;  %v1217_v13 = vsel %vm241_vm3, %v2418_v8, 0.0 }
 0xd88   :  { %1218 = vadd.xlane.f32.xlu0 %v1217_v13 }
 0xd89   :  { %2419 = vpow2.f32 %v1444_v10 }
 0xd8a   :  { %2421 = vpow2.f32 %v1332_v18 }
 0xd91   :  { %1111 = vrot.lane.b32.xlu1 %v2803_v19, %s2473_s29 }
 0xd96   :  { %v2420_v14 = vpop.eup %2419 }
 0xd97   :  { %v1446_v16 = vsel %vm241_vm3, %v2420_v14, 0.0  ;;  %v2422_v20 = vpop.eup %2421 }
 0xd98   :  { %1447 = vadd.xlane.f32.xlu0 %v1446_v16  ;;  %v1334_v21 = vsel %vm241_vm3, %v2422_v20, 0.0 }
 0xdae   :  { %1223 = vrot.lane.b32.xlu0 %v2803_v19, %s2472_s4 }
 0xdb5   :  { %1335 = vadd.xlane.f32.xlu1 %v1334_v21 }
 0xdc6   :  { %1340 = vrot.lane.b32.xlu1 %v2809_v23, %s2473_s29 }
 0xdca   :  { %1452 = vrot.lane.b32.xlu1 %v2809_v23, %s2472_s4 }
 0xe09   :  { %v1107_v22 = vpop.xlane.xlu1 %1106 }
 0xe0a   :  { %2423 = vrcp.f32 %v1107_v22 }
 0xe0d   :  { %v1112_v24 = vpop.permute.xlu1 %1111 }
 0xe0e   :  { %v1117_v25 = vsel %vm259_vm4, %v1112_v24, 0 }
 0xe0f   :  { %2255 = vmatpush3.bf16.msra.mxu1 %v1117_v25 }
 0xe10   :  { %2266 = vmatprep.subr.bf16.mxu1 %v2467_v15 }
 0xe11   :  { %v1219_v26 = vpop.xlane.xlu0 %1218 }
 0xe12   :  { %2425 = vrcp.f32 %v1219_v26 }
 0xe17   :  { %v2424_v19 = vpop.eup %2423 }
 0xe18   :  { %v1109_v27 = vmul.f32 %v2424_v19, %v2416_v4 }
 0xe1a   :  { %v1110_v28 = vpack.c.bf16 %v1109_v27, %v1109_v27 }
 0xe1c   :  { %2257 = vmatmul.mubr.msk.bf16.vlgmr.msra.gmra.mxu1 %vm241_vm3, %v1110_v28 }
 0xe1d   :  { %2268 = vmatprep.mubr.msk.bf16.mxu1 %vm2468_vm1, %v2467_v15 }
 0xe1f   :  { %v2426_v29 = vpop.eup %2425 }
 0xe20   :  { %v1221_v30 = vmul.f32 %v2426_v29, %v2418_v8 }
 0xe21   :  { %v1448_v23 = vpop.xlane.xlu0 %1447 }
 0xe22   :  { %v1222_v35 = vpack.c.bf16 %v1221_v30, %v1221_v30 }
 0xe25   :  { %v1224_v33 = vpop.permute.xlu0 %1223 }
 0xe26   :  { %v1229_v34 = vsel %vm259_vm4, %v1224_v33, 0 }
 0xe27   :  { %2267 = vmatpush3.bf16.msra.mxu1 %v1229_v34 }
 0xe28   :  { %2278 = vmatprep.subr.bf16.mxu1 %v2467_v15 }
 0xe2a   :  { %2269 = vmatmul.mubr.msk.bf16.vlgmr.msra.gmra.mxu1 %vm241_vm3, %v1222_v35 }
 0xe2b   :  { %2280 = vmatprep.mubr.msk.bf16.mxu1 %vm2468_vm1, %v2467_v15 }
 0xe3e   :  { %v1336_v36 = vpop.xlane.xlu1 %1335 }
 0xe3f   :  { %2427 = vrcp.f32 %v1336_v36 }
 0xe40   :  { %2429 = vrcp.f32 %v1448_v23  ;;  %v2374_v23 = vld [vmem:[%s2991_s10 + $0x10] sm:$0xff]  }
 0xe42   :  { %v1341_v37 = vpop.permute.xlu1 %1340 }
 0xe43   :  { %v1346_v39 = vsel %vm259_vm4, %v1341_v37, 0 }
 0xe44   :  { %2279 = vmatpush3.bf16.msra.mxu1 %v1346_v39 }
 0xe45   :  { %2290 = vmatprep.subr.bf16.mxu1 %v2467_v15 }
 0xe46   :  { %v1453_v43 = vpop.permute.xlu1 %1452 }
 0xe47   :  { %v1458_v46 = vsel %vm259_vm4, %v1453_v43, 0 }
 0xe4c   :  { %v2428_v40 = vpop.eup %2427 }
 0xe4d   :  { %v1338_v41 = vmul.f32 %v2428_v40, %v2422_v20  ;;  %v2430_v45 = vpop.eup %2429 }
 0xe4e   :  { %v1450_v47 = vmul.f32 %v2430_v45, %v2420_v14 }
 0xe4f   :  { %v1339_v44 = vpack.c.bf16 %v1338_v41, %v1338_v41  ;;  %v2052_v41 = vld [vmem:[%s2989_s8 + $0x1] ss:$0 sm:$0xff] }
 0xe50   :  { %v1451_v48 = vpack.c.bf16 %v1450_v47, %v1450_v47 }
 0xe51   :  { %2281 = vmatmul.mubr.msk.bf16.vlgmr.msra.gmra.mxu1 %vm241_vm3, %v1339_v44 }
 0xe52   :  { %2291 = vmatpush3.bf16.msra.mxu1 %v1458_v46  ;;  %2292 = vmatprep.mubr.msk.bf16.mxu1 %vm2468_vm1, %v2467_v15  ;;  %v2053_v46 = vld [vmem:[%s2990_s9 + $0x1] ss:$0 sm:$0xff] }
 0xe53   :  { %2304 = vmatprep.subr.bf16.mxu1 %v2467_v15 }
 0xe59   :  { %2293 = vmatmul.mubr.msk.bf16.vlgmr.msra.gmra.mxu1 %vm241_vm3, %v1451_v48 }
 0xe5a   :  { %2308 = vmatprep.mubr.msk.bf16.mxu1 %vm2468_vm1, %v2467_v15 }
 0xedc   :  { %v1153_v50 = vpop.f32.mrf.mxu1 }
 0xede   :  { %v2258_v51 = vpop.f32.mrf.mxu1 }
 0xedf   :  { %v2375_v51 = vld [vmem:[%s2993_s12 + $0x38] sm:$0xff]  }
 0xee0   :  { %v1156_v52 = vpop.f32.mrf.mxu1 }
 0xee1   :  { %v2376_v52 = vld [vmem:[%s2993_s12 + $0x30] sm:$0xff]  }
 0xee2   :  { %v2259_v53 = vpop.f32.mrf.mxu1 }
 0xee3   :  { %v2377_v53 = vld [vmem:[%s2993_s12 + $0x28] sm:$0xff]  }
 0xeea   :  { %v1265_v38 = vpop.f32.mrf.mxu1 }
 0xeec   :  { %v2270_v54 = vpop.f32.mrf.mxu1 }
 0xeed   :  { %v2059_v54 = vld [vmem:[%s2992_s11 + $0x1] ss:$0 sm:$0xff] }
 0xeee   :  { %v1268_v55 = vpop.f32.mrf.mxu1 }
 0xef0   :  { %v2271_v31 = vpop.f32.mrf.mxu1 }
 0xf11   :  { %v1382_v58 = vpop.f32.mrf.mxu1 }
 0xf13   :  { %v2282_v32 = vpop.f32.mrf.mxu1 }
 0xf15   :  { %v1385_v42 = vpop.f32.mrf.mxu1 }
 0xf17   :  { %v2283_v57 = vpop.f32.mrf.mxu1 }
 0xf19   :  { %v1494_v59 = vpop.f32.mrf.mxu1 }
 0xf1a   :  { %v2354_v60 = vpack.i.bf16 %v1494_v59, %v1265_v38  ;;  %v2378_v38 = vld [vmem:[%s2993_s12 + $0x20] sm:$0xff]  }
 0xf1b   :  { %v2294_v61 = vpop.f32.mrf.mxu1 }
 0xf1c   :  { %2355 = vrot.lane.b32.xlu1 %v2354_v60, %s2474_s22 }
 0xf1d   :  { %v1497_v62 = vpop.f32.mrf.mxu1 }
 0xf1f   :  { %v2295_v63 = vpop.f32.mrf.mxu1 }
 0xf8e   :  { %v2356_v0 = vpop.permute.xlu1 %2355 }
 0xf8f   :  { %v2358_v1 = vunpack.i.h.bf16 %v2356_v0  ;;  %v2357_v2 = vunpack.i.l.bf16 %v2356_v0 }
 0xf91   :  { %v1504_v3 = vsel %vm188_vm2, %v1382_v58, %v2358_v1  ;;  %v1275_v4 = vsel %vm188_vm2, %v1153_v50, %v2357_v2 }
 0xf92   :  { %v1512_v5 = vpack.c.bf16 %v1504_v3, %v1275_v4 }
 0xf94   :  { %2301 = vmatmul.mubr.msk.bf16.vlgmr.msra.gmra.mxu0 %vm71_vm0, %v1512_v5  ;;  %v2072_v5 = vld [vmem:[%s2994_s13 + $0x1] ss:$0 sm:$0xff] }
 0xf95   :  { %2320 = vmatprep.mubr.msk.bf16.mxu0 %vm2468_vm1, %v2467_v15  ;;  %2313 = vmatpush3.bf16.msra.mxu0 %v2375_v51 }
 0xf96   :  { %2314 = vmatprep.subr.bf16.mxu0 %v2467_v15 }
 0xf99   :  { %2315 = vmatpush3.bf16.msra.mxu0 %v2376_v52  ;;  %v2381_v52 = vld [vmem:[%s2999_s18 + $0x8] sm:$0xff]  }
 0xf9a   :  { %2316 = vmatprep.subr.bf16.mxu0 %v2467_v15 }
 0xf9d   :  { %2317 = vmatpush3.bf16.msra.mxu0 %v2377_v53  ;;  %v2382_v53 = vld [vmem:[%s2999_s18] sm:$0xff]   ;;  %s2475_s18 = smov [#allocation2]  }
 0xf9e   :  { %2318 = vmatprep.subr.bf16.mxu0 %v2467_v15  ;;  %s1984_s26 = sshll.u32 %s2475_s18, 4  ;;  %s1985_s26 = int_to_ptr.vmem [resolvable:$true] %s1984_s26 }
 0xf9f   :  { %p2450_p1 = scmp.lt.s32.totalorder %s1985_s26, %s1985_s26 }
 0xfa1   :  { %2319 = vmatpush3.bf16.msra.mxu0 %v2378_v38  ;;  %v2082_v38 = vld [vmem:[%s2998_s17] ss:$0 sm:$0xff]  ;;  %s2445_s17 = scalar_lea.vmem %s1985_s26, 32 }
 0xfa2   :  { %p2446_p0 = scmp.ne.s32.totalorder %s1985_s26, %s2445_s17  ;;  %p2451_p2 = scmp.lt.s32.totalorder %s2445_s17, %s2445_s17 }
 0xfa4   :  { %p2452_p3 = por %p2451_p2, %p2450_p1 }
 0xfa6   :  { %p2453_p4 = pnand %p2452_p3, %p2446_p0 }
0x1054   :  { %v1568_v7 = vpop.f32.mrf.mxu0 }
0x1055   :  { %v1569_v9 = vadd.f32 %v2046_v6, %v1568_v7 }
0x1056   :  { %v2302_v8 = vpop.f32.mrf.mxu0 }
0x1057   :  { %v1575_v10 = vadd.f32 %v1569_v9, %v2791_v11 }
0x1058   :  { %v1571_v13 = vpop.f32.mrf.mxu0 }
0x1059   :  { %v1572_v14 = vadd.f32 %v2046_v6, %v1571_v13  ;;  %v1581_v16 = vsel %vm71_vm0, %v1575_v10, 0.0 }
0x105a   :  { %1582 = vadd.xlane.f32.xlu0 %v1581_v16  ;;  %v2303_v17 = vpop.f32.mrf.mxu0 }
0x105b   :  { %v1576_v18 = vadd.f32 %v1572_v14, %v2793_v12  ;;  %v2373_v12 = vld [vmem:[%s2991_s10 + $0x18] sm:$0xff]  }
0x105c   :  { %2305 = vmatpush3.bf16.msra.mxu1 %v2373_v12  ;;  %v2380_v12 = vld [vmem:[%s2997_s16] sm:$0xff]  }
0x105d   :  { %v1584_v20 = vsel %vm71_vm0, %v1576_v18, 0.0  ;;  %2306 = vmatprep.subr.bf16.mxu1 %v2467_v15 }
0x105e   :  { %1585 = vadd.xlane.f32.xlu1 %v1584_v20 }
0x1060   :  { %2307 = vmatpush3.bf16.msra.mxu1 %v2374_v23 }
0x1061   :  { %2324 = vmatprep.subr.bf16.mxu1 %v2467_v15 }
0x10e3   :  { %v1583_v21 = vpop.xlane.xlu0 %1582 }
0x10e4   :  { %v1587_v22 = vmul.f32 0.03125, %v1583_v21 }
0x10e6   :  { %v1589_v24 = vsub.f32 %v1575_v10, %v1587_v22 }
0x10e7   :  { %v1586_v25 = vpop.xlane.xlu1 %1585 }
0x10e8   :  { %v1588_v26 = vmul.f32 0.03125, %v1586_v25  ;;  %v1591_v19 = vmul.f32 %v1589_v24, %v1589_v24 }
0x10ea   :  { %v1590_v27 = vsub.f32 %v1576_v18, %v1588_v26  ;;  %v1593_v11 = vsel %vm71_vm0, %v1591_v19, 0.0 }
0x10eb   :  { %1594 = vadd.xlane.f32.xlu0 %v1593_v11 }
0x10ec   :  { %v1592_v28 = vmul.f32 %v1590_v27, %v1590_v27 }
0x10ee   :  { %v1596_v29 = vsel %vm71_vm0, %v1592_v28, 0.0 }
0x10ef   :  { %1597 = vadd.xlane.f32.xlu0 %v1596_v29  ;;  %v2379_v29 = vld [vmem:[%s2997_s16 + $0x8] sm:$0xff]  }
0x1174   :  { %v1595_v30 = vpop.xlane.xlu0 %1594 }
0x1175   :  { %v1599_v33 = vmul.f32 0.03125, %v1595_v30 }
0x1177   :  { %v1601_v34 = vadd.f32 1e-12, %v1599_v33 }
0x1178   :  { %v1598_v35 = vpop.xlane.xlu0 %1597 }
0x1179   :  { %2431 = vrsqrt.f32 %v1601_v34  ;;  %v1600_v36 = vmul.f32 0.03125, %v1598_v35 }
0x117b   :  { %v1602_v37 = vadd.f32 1e-12, %v1600_v36 }
0x117d   :  { %2433 = vrsqrt.f32 %v1602_v37 }
0x1186   :  { %v2432_v39 = vpop.eup %2431 }
0x1187   :  { %v1605_v40 = vmul.f32 %v2432_v39, %v1589_v24 }
0x1189   :  { %v1613_v45 = vmul.f32 %v2052_v41, %v1605_v40 }
0x118a   :  { %v2434_v43 = vpop.eup %2433 }
0x118b   :  { %v1606_v44 = vmul.f32 %v2434_v43, %v1590_v27  ;;  %v1621_v48 = vadd.f32 %v2053_v46, %v1613_v45 }
0x118d   :  { %v1614_v47 = vmul.f32 %v2052_v41, %v1606_v44  ;;  %v2080_v41 = vld [vmem:[%s2995_s14 + $0x1] ss:$0 sm:$0xff] }
0x118f   :  { %v1622_v49 = vadd.f32 %v2053_v46, %v1614_v47  ;;  %v2081_v46 = vld [vmem:[%s2996_s15 + $0x1] ss:$0 sm:$0xff] }
0x1191   :  { %v1630_v50 = vpack.c.bf16 %v1622_v49, %v1621_v48 }
0x1193   :  { %2309 = vmatmul.mubr.msk.bf16.vlgmr.msra.gmra.mxu1 %vm71_vm0, %v1630_v50 }
0x1194   :  { %2328 = vmatprep.mubr.msk.bf16.mxu1 %vm2468_vm1, %v2467_v15  ;;  %2325 = vmatpush3.bf16.msra.mxu1 %v2379_v29 }
0x1195   :  { %2326 = vmatprep.subr.bf16.mxu1 %v2467_v15 }
0x1198   :  { %2327 = vmatpush3.bf16.msra.mxu1 %v2380_v12 }
0x1199   :  { %2332 = vmatprep.subr.bf16.mxu1 %v2467_v15 }
0x1253   :  { %v1686_v55 = vpop.f32.mrf.mxu1 }
0x1254   :  { %v1687_v31 = vadd.f32 %v2059_v54, %v1686_v55 }
0x1255   :  { %v2310_v56 = vpop.f32.mrf.mxu1 }
0x1256   :  { %v1695_v58 = vmul.f32 0.70710677, %v1687_v31  ;;  %v1693_v63 = vmul.f32 0.5, %v1687_v31 }
0x1257   :  { %v1689_v32 = vpop.f32.mrf.mxu1 }
0x1258   :  { %2435 = verf.f32 %v1695_v58  ;;  %v1690_v42 = vadd.f32 %v2059_v54, %v1689_v32 }
0x1259   :  { %v2311_v57 = vpop.f32.mrf.mxu1 }
0x125a   :  { %v1696_v59 = vmul.f32 0.70710677, %v1690_v42  ;;  %v1694_v0 = vmul.f32 0.5, %v1690_v42 }
0x125c   :  { %2437 = verf.f32 %v1696_v59 }
0x1265   :  { %v2436_v60 = vpop.eup %2435 }
0x1266   :  { %v1699_v61 = vadd.f32 1.0, %v2436_v60 }
0x1268   :  { %v1701_v2 = vmul.f32 %v1699_v61, %v1693_v63 }
0x1269   :  { %v2438_v62 = vpop.eup %2437 }
0x126a   :  { %v1700_v1 = vadd.f32 1.0, %v2438_v62 }
0x126c   :  { %v1702_v3 = vmul.f32 %v1700_v1, %v1694_v0 }
0x126e   :  { %v1714_v4 = vpack.c.bf16 %v1702_v3, %v1701_v2 }
0x1270   :  { %2321 = vmatmul.mubr.msk.bf16.vlgmr.msra.gmra.mxu0 %vm886_vm5, %v1714_v4 }
0x1330   :  { %v1782_v6 = vpop.f32.mrf.mxu0 }
0x1331   :  { %v1783_v7 = vadd.f32 %v2072_v5, %v1782_v6 }
0x1332   :  { %v2322_v9 = vpop.f32.mrf.mxu0 }
0x1333   :  { %v1789_v8 = vadd.f32 %v1783_v7, %v1621_v48 }
0x1334   :  { %v1785_v10 = vpop.f32.mrf.mxu0 }
0x1335   :  { %v1786_v13 = vadd.f32 %v2072_v5, %v1785_v10  ;;  %v1795_v14 = vsel %vm71_vm0, %v1789_v8, 0.0 }
0x1336   :  { %1796 = vadd.xlane.f32.xlu1 %v1795_v14  ;;  %v2323_v16 = vpop.f32.mrf.mxu0 }
0x1337   :  { %v1790_v17 = vadd.f32 %v1786_v13, %v1622_v49 }
0x1339   :  { %v1798_v18 = vsel %vm71_vm0, %v1790_v17, 0.0 }
0x133a   :  { %1799 = vadd.xlane.f32.xlu0 %v1798_v18 }
0x13bf   :  { %v1797_v20 = vpop.xlane.xlu1 %1796 }
0x13c0   :  { %v1801_v21 = vmul.f32 0.03125, %v1797_v20 }
0x13c2   :  { %v1803_v22 = vsub.f32 %v1789_v8, %v1801_v21 }
0x13c3   :  { %v1800_v24 = vpop.xlane.xlu0 %1799 }
0x13c4   :  { %v1802_v25 = vmul.f32 0.03125, %v1800_v24  ;;  %v1805_v26 = vmul.f32 %v1803_v22, %v1803_v22 }
0x13c6   :  { %v1804_v19 = vsub.f32 %v1790_v17, %v1802_v25  ;;  %v1807_v27 = vsel %vm71_vm0, %v1805_v26, 0.0 }
0x13c7   :  { %1808 = vadd.xlane.f32.xlu1 %v1807_v27 }
0x13c8   :  { %v1806_v11 = vmul.f32 %v1804_v19, %v1804_v19 }
0x13ca   :  { %v1810_v28 = vsel %vm71_vm0, %v1806_v11, 0.0 }
0x13cb   :  { %1811 = vadd.xlane.f32.xlu0 %v1810_v28 }
0x1450   :  { %v1809_v23 = vpop.xlane.xlu1 %1808 }
0x1451   :  { %v1813_v30 = vmul.f32 0.03125, %v1809_v23 }
0x1453   :  { %v1815_v33 = vadd.f32 1e-12, %v1813_v30 }
0x1454   :  { %v1812_v34 = vpop.xlane.xlu0 %1811 }
0x1455   :  { %2439 = vrsqrt.f32 %v1815_v33  ;;  %v1814_v35 = vmul.f32 0.03125, %v1812_v34 }
0x1457   :  { %v1816_v36 = vadd.f32 1e-12, %v1814_v35 }
0x1459   :  { %2441 = vrsqrt.f32 %v1816_v36 }
0x1462   :  { %v2440_v37 = vpop.eup %2439 }
0x1463   :  { %v1819_v39 = vmul.f32 %v2440_v37, %v1803_v22 }
0x1465   :  { %v1827_v44 = vmul.f32 %v2080_v41, %v1819_v39 }
0x1466   :  { %v2442_v40 = vpop.eup %2441 }
0x1467   :  { %v1820_v43 = vmul.f32 %v2442_v40, %v1804_v19  ;;  %v1835_v48 = vadd.f32 %v2081_v46, %v1827_v44 }
0x1469   :  { %v1828_v45 = vmul.f32 %v2080_v41, %v1820_v43 }
0x146b   :  { %v1836_v47 = vadd.f32 %v2081_v46, %v1828_v45 }
0x146d   :  { %v1838_v49 = vrot.slane %v1836_v47, 7 }
0x146f   :  { %v1841_v50 = vsel %vm1840_vm6, %v1835_v48, %v1838_v49 }
0x1470   :  { %v1847_v51 = vpack.c.bf16 %v1841_v50, %v1841_v50 }
0x1472   :  { %2329 = vmatmul.mubr.msk.bf16.vlgmr.msra.gmra.mxu1 %vm71_vm0, %v1847_v51 }
0x1473   :  { %2336 = vmatprep.mubr.msk.bf16.mxu1 %vm2468_vm1, %v2467_v15  ;;  %2333 = vmatpush3.bf16.msra.mxu1 %v2381_v52 }
0x1474   :  { %2334 = vmatprep.subr.bf16.mxu1 %v2467_v15  ;;  %v2086_v15 = vld [vmem:[%s3000_s19] ss:$0 sm:$0xff] }
0x1477   :  { %2335 = vmatpush3.bf16.msra.mxu1 %v2382_v53 }
0x1532   :  { %v1903_v54 = vpop.f32.mrf.mxu1 }
0x1533   :  { %v1904_v55 = vadd.f32 %v2082_v38, %v1903_v54 }
0x1534   :  { %v2330_v31 = vpop.f32.mrf.mxu1 }
0x1535   :  { %2443 = vtanh.f32 %v1904_v55 }
0x1536   :  { %v1906_v56 = vpop.f32.mrf.mxu1 }
0x1538   :  { %v2331_v58 = vpop.f32.mrf.mxu1 }
0x1542   :  { %v2444_v32 = vpop.eup %2443 }
0x1543   :  { %v1915_v42 = vpack.c.bf16 %v2444_v32, %v2444_v32 }
0x1545   :  { %2337 = vmatmul.mubr.msk.bf16.vlgmr.msra.gmra.mxu1 %vm71_vm0, %v1915_v42 }
0x1605   :  { %v1971_v57 = vpop.f32.mrf.mxu1 }
0x1606   :  { %v1972_v59 = vadd.f32 %v2086_v15, %v1971_v57 }
0x1607   :  { %v2338_v60 = vpop.f32.mrf.mxu1 }
0x1608   :  { %1977 = vst [vmem:[#allocation2] sm:$0x3] %v1972_v59 }
0x1609   :  { %v1974_v61 = vpop.f32.mrf.mxu1 }
0x160a   :  { %2456 = shalt.err (!%p2453_p4)
}
0x160b   :  { %1987 = dma.vmem_to_hbm [thread:$0]  %s1985_s26, 32, %s3001_s20, [#allocation3]   ;;  %v2339_v62 = vpop.f32.mrf.mxu1 }
0x160c   :  { %2465 = dma.done.wait [#allocation3], 32  }
0x160d   :  { %2466 = vsyncadd [#allocation3], 4294967264 }
0x160e   :  { %1991 = vsyncpa [#allocation3], 1 }

</bundles_post_ra>
